<compile_context>
chip_gen: v5e
topology: v5e:2x2
jax: 0.10.0
libtpu: 0.0.40
codegen_flags: <defaults>
</compile_context>

<pallas_src>
import functools

import numpy as np
import jax
import jax.numpy as jnp
from jax.experimental import pallas as pl
from jax.experimental.pallas import tpu as pltpu


def _round_up(x, m):
    return (x + m - 1) // m * m


# ----------------------------------------------------------------------------
# Kernel 1: fused AvgPool2d(APSK) + Conv2d 1x1 (bias=False)
# ----------------------------------------------------------------------------
def _pool_conv_kernel(x_ref, wbig_ref, pw_ref, y_ref, *, apsk, h_tile):
    # x_ref:    (1, Cin, h_tile*APSK, W)   input slab for this (batch, row-tile)
    # wbig_ref: (Cout_p, Cin*APSK)         weight with H-pooling folded in (stationary LHS)
    # pw_ref:   (W, Wp)                    constant W-pooling matrix
    # y_ref:    (1, h_tile, Cout_p, Wp)    pooled+convolved output tile
    cin = x_ref.shape[1]
    width = x_ref.shape[3]
    wmat = wbig_ref[...]        # hoisted: resident across the loop
    pool_w = pw_ref[...]
    for t in range(h_tile):     # static, small trip count (unrolled at trace time)
        # (Cin, APSK, W) slab of input rows feeding pooled row t of this tile.
        slab = x_ref[0, :, t * apsk:(t + 1) * apsk, :]
        # Merge the two outer dims -> (Cin*APSK, W); layout-preserving (APSK % 8 == 0).
        slab = slab.reshape(cin * apsk, width)
        # Channel mixing + H-pooling on the MXU: (Cout_p, Cin*APSK) @ (Cin*APSK, W).
        u = jnp.dot(wmat, slab, preferred_element_type=jnp.float32)        # (Cout_p, W)
        # W-pooling on the MXU: (Cout_p, W) @ (W, Wp).
        y_ref[0, t] = jnp.dot(u, pool_w, preferred_element_type=jnp.float32)  # (Cout_p, Wp)


# ----------------------------------------------------------------------------
# Kernel 2: fused BatchNorm2d (training mode, batch statistics) + ReLU
# ----------------------------------------------------------------------------
def _bn_relu_kernel(y_ref, o_ref, *, eps):
    # y_ref / o_ref: (B, Hp, Cout_p, Wp) -- small post-pooling tensor, fits VMEM easily.
    y = y_ref[...]
    mean = jnp.mean(y, axis=(0, 1, 3), keepdims=True)                       # per channel
    var = jnp.mean(jnp.square(y - mean), axis=(0, 1, 3), keepdims=True)     # biased var
    o_ref[...] = jnp.maximum((y - mean) * jax.lax.rsqrt(var + eps), 0.0)


# ----------------------------------------------------------------------------
# Wrapper: SPPBranch forward
# ----------------------------------------------------------------------------
def spp_branch_forward(x, weight, apsk, *, eps=1e-5, h_tile=None):
    """x: (B, Cin, H, W) f32; weight: (Cout, Cin) f32 (1x1 conv, bias=False).

    Returns (B, Cout, H//APSK, W//APSK) f32, matching the PyTorch SPPBranch in
    training mode (BatchNorm with batch statistics, weight=1 / bias=0).
    """
    B, Cin, H, W = x.shape
    Cout = weight.shape[0]
    assert weight.shape == (Cout, Cin)
    # PyTorch AvgPool2d floors; we require divisibility (crop beforehand otherwise).
    assert H % apsk == 0 and W % apsk == 0, "H and W must be divisible by APSK"
    Hp, Wp = H // apsk, W // apsk
    Cp = _round_up(Cout, 8)          # pad output channels to the sublane tile (weight only)

    if h_tile is None:               # tile of pooled rows handled per grid step
        h_tile = Hp
        while h_tile > 8 and h_tile % 2 == 0:
            h_tile //= 2
    assert Hp % h_tile == 0
    hb = h_tile * apsk               # input rows per grid step
    assert hb == H or hb % 8 == 0    # BlockSpec (8,128) rule on the sublane dim

    x = x.astype(jnp.float32)
    w = weight.astype(jnp.float32)

    # Fold the H-pooling (1/APSK) and the channel padding into the tiny weight.
    wbig = jnp.repeat(w, apsk, axis=1) / float(apsk)           # (Cout, Cin*APSK)
    wbig = jnp.pad(wbig, ((0, Cp - Cout), (0, 0)))             # (Cp,   Cin*APSK)

    # Constant W-pooling matrix (W, Wp): pw[w, wp] = 1/APSK iff w // APSK == wp.
    pw = (jnp.arange(W)[:, None] // apsk == jnp.arange(Wp)[None, :])
    pw = pw.astype(jnp.float32) / float(apsk)

    grid = (B, Hp // h_tile)
    y = pl.pallas_call(
        functools.partial(_pool_conv_kernel, apsk=apsk, h_tile=h_tile),
        out_shape=jax.ShapeDtypeStruct((B, Hp, Cp, Wp), jnp.float32),
        grid=grid,
        in_specs=[
            pl.BlockSpec((1, Cin, hb, W), lambda b, h: (b, 0, h, 0)),
            pl.BlockSpec((Cp, Cin * apsk), lambda b, h: (0, 0)),
            pl.BlockSpec((W, Wp), lambda b, h: (0, 0)),
        ],
        out_specs=pl.BlockSpec((1, h_tile, Cp, Wp), lambda b, h: (b, h, 0, 0)),
        compiler_params=pltpu.CompilerParams(
            dimension_semantics=("parallel", "parallel")),
    )(x, wbig, pw)

    # Fused BatchNorm(training) + ReLU over the small pooled tensor (single VMEM pass).
    out = pl.pallas_call(
        functools.partial(_bn_relu_kernel, eps=eps),
        out_shape=jax.ShapeDtypeStruct((B, Hp, Cp, Wp), jnp.float32),
        grid=(1,),
        in_specs=[pl.BlockSpec((B, Hp, Cp, Wp), lambda i: (0, 0, 0, 0))],
        out_specs=pl.BlockSpec((B, Hp, Cp, Wp), lambda i: (0, 0, 0, 0)),
        compiler_params=pltpu.CompilerParams(dimension_semantics=("arbitrary",)),
    )(y)

    # Back to NCHW and drop the padded channels (tiny tensor; padded channels are all-zero).
    return jnp.transpose(out, (0, 2, 1, 3))[:, :Cout]


# ----------------------------------------------------------------------------
# Pure-JAX reference (mirror of the PyTorch module, training-mode BN)
# ----------------------------------------------------------------------------
def spp_branch_reference(x, weight, apsk, eps=1e-5):
    B, Cin, H, W = x.shape
    Hp, Wp = H // apsk, W // apsk
    pooled = x.reshape(B, Cin, Hp, apsk, Wp, apsk).mean(axis=(3, 5))
    y = jnp.einsum('oc,bchw->bohw', weight, pooled)
    mean = y.mean(axis=(0, 2, 3), keepdims=True)
    var = jnp.square(y - mean).mean(axis=(0, 2, 3), keepdims=True)
    return jax.nn.relu((y - mean) * jax.lax.rsqrt(var + eps))


# ----------------------------------------------------------------------------
# main
# ----------------------------------------------------------------------------
if __name__ == "__main__":
    B, Cin, Cout = 2, 16, 8
    H, W = 128, 128
    APSK = 8            # AvgPool2d kernel == stride

    key = jax.random.PRNGKey(0)
    kx, kw = jax.random.split(key)
    x = jax.random.normal(kx, (B, Cin, H, W), jnp.float32)
    bound = 1.0 / np.sqrt(Cin)                        # PyTorch Conv2d default init range
    weight = jax.random.uniform(kw, (Cout, Cin), jnp.float32, -bound, bound)

    fwd = jax.jit(functools.partial(spp_branch_forward, apsk=APSK))
    out = fwd(x, weight)
    jax.block_until_ready(out)

    assert out.shape == (B, Cout, H // APSK, W // APSK)
    assert np.all(np.isfinite(np.asarray(out)))

    ref = spp_branch_reference(x, weight, APSK)
    err = float(jnp.max(jnp.abs(out - ref)))
    assert err < 5e-2, f"max abs error vs reference: {err}"

    print("KERNEL_OK")
</pallas_src>

<mosaic_0001>
module attributes {stable_mosaic.version = 11 : i64} {
  func.func @_bn_relu_kernel(%arg0: i32, %arg1: memref<2x16x8x16xf32, #tpu.memory_space<vmem>>, %arg2: memref<2x16x8x16xf32, #tpu.memory_space<vmem>>) attributes {dimension_semantics = [#tpu.dimension_semantics<arbitrary>], iteration_bounds = array<i64: 1>, scalar_prefetch = 0 : i64, scratch_operands = 0 : i64, tpu.core_type = #tpu.core_type<tc>, window_params = [{pipeline_mode = #tpu.pipeline_mode<synchronous>, transform_indices = @transform_0, window_bounds = array<i64: 2, 16, 8, 16>}, {pipeline_mode = #tpu.pipeline_mode<synchronous>, transform_indices = @transform_1, window_bounds = array<i64: 2, 16, 8, 16>}]} {
    %c0 = arith.constant 0 : index
    %c0_0 = arith.constant 0 : index
    %c0_1 = arith.constant 0 : index
    %c0_2 = arith.constant 0 : index
    %0 = vector.load %arg1[%c0, %c0_0, %c0_1, %c0_2] : memref<2x16x8x16xf32, #tpu.memory_space<vmem>>, vector<2x16x8x16xf32>
    %cst = arith.constant dense<0.000000e+00> : vector<8xf32>
    %1 = vector.multi_reduction <add>, %0, %cst [0, 1, 3] : vector<2x16x8x16xf32> to vector<8xf32>
    %2 = vector.shape_cast %1 : vector<8xf32> to vector<1x1x8x1xf32>
    %cst_3 = arith.constant 5.120000e+02 : f32
    %3 = vector.broadcast %cst_3 : f32 to vector<1x1x8x1xf32>
    %4 = arith.divf %2, %3 : vector<1x1x8x1xf32>
    %5 = vector.broadcast %4 : vector<1x1x8x1xf32> to vector<2x16x8x16xf32>
    %6 = arith.subf %0, %5 : vector<2x16x8x16xf32>
    %7 = arith.mulf %6, %6 : vector<2x16x8x16xf32>
    %cst_4 = arith.constant dense<0.000000e+00> : vector<8xf32>
    %8 = vector.multi_reduction <add>, %7, %cst_4 [0, 1, 3] : vector<2x16x8x16xf32> to vector<8xf32>
    %9 = vector.shape_cast %8 : vector<8xf32> to vector<1x1x8x1xf32>
    %cst_5 = arith.constant 5.120000e+02 : f32
    %10 = vector.broadcast %cst_5 : f32 to vector<1x1x8x1xf32>
    %11 = arith.divf %9, %10 : vector<1x1x8x1xf32>
    %12 = vector.broadcast %4 : vector<1x1x8x1xf32> to vector<2x16x8x16xf32>
    %13 = arith.subf %0, %12 : vector<2x16x8x16xf32>
    %cst_6 = arith.constant 9.99999974E-6 : f32
    %14 = vector.broadcast %cst_6 : f32 to vector<1x1x8x1xf32>
    %15 = arith.addf %11, %14 : vector<1x1x8x1xf32>
    %16 = math.rsqrt %15 : vector<1x1x8x1xf32>
    %17 = vector.broadcast %16 : vector<1x1x8x1xf32> to vector<2x16x8x16xf32>
    %18 = arith.mulf %13, %17 : vector<2x16x8x16xf32>
    %cst_7 = arith.constant 0.000000e+00 : f32
    %19 = vector.broadcast %cst_7 : f32 to vector<2x16x8x16xf32>
    %20 = arith.maximumf %18, %19 : vector<2x16x8x16xf32>
    %c0_8 = arith.constant 0 : index
    %c0_9 = arith.constant 0 : index
    %c0_10 = arith.constant 0 : index
    %c0_11 = arith.constant 0 : index
    %21 = vector.load %arg2[%c0_8, %c0_9, %c0_10, %c0_11] : memref<2x16x8x16xf32, #tpu.memory_space<vmem>>, vector<2x16x8x16xf32>
    tpu.vector_store %arg2[%c0_8, %c0_9, %c0_10, %c0_11], %20 {strides = array<i32>} : memref<2x16x8x16xf32, #tpu.memory_space<vmem>>, vector<2x16x8x16xf32>,
    return
  }
  func.func @transform_0(%arg0: i32) -> (i32, i32, i32, i32) {
    %c0_i32 = arith.constant 0 : i32
    %c0_i32_0 = arith.constant 0 : i32
    %c0_i32_1 = arith.constant 0 : i32
    %c0_i32_2 = arith.constant 0 : i32
    %c0_i32_3 = arith.constant 0 : i32
    return %c0_i32, %c0_i32_0, %c0_i32_1, %c0_i32_2 : i32, i32, i32, i32
  }
  func.func @transform_1(%arg0: i32) -> (i32, i32, i32, i32) {
    %c0_i32 = arith.constant 0 : i32
    %c0_i32_0 = arith.constant 0 : i32
    %c0_i32_1 = arith.constant 0 : i32
    %c0_i32_2 = arith.constant 0 : i32
    %c0_i32_3 = arith.constant 0 : i32
    return %c0_i32, %c0_i32_0, %c0_i32_1, %c0_i32_2 : i32, i32, i32, i32
  }
}

module attributes {stable_mosaic.version = 11 : i64} {
  func.func @_pool_conv_kernel(%arg0: i32, %arg1: i32, %arg2: memref<1x16x64x128xf32, #tpu.memory_space<vmem>>, %arg3: memref<8x128xf32, #tpu.memory_space<vmem>>, %arg4: memref<128x16xf32, #tpu.memory_space<vmem>>, %arg5: memref<1x8x8x16xf32, #tpu.memory_space<vmem>>) attributes {dimension_semantics = [#tpu.dimension_semantics<parallel>, #tpu.dimension_semantics<parallel>], iteration_bounds = array<i64: 2, 2>, scalar_prefetch = 0 : i64, scratch_operands = 0 : i64, tpu.core_type = #tpu.core_type<tc>, window_params = [{transform_indices = @transform_0, window_bounds = array<i64: 1, 16, 64, 128>}, {pipeline_mode = #tpu.pipeline_mode<synchronous>, transform_indices = @transform_1, window_bounds = array<i64: 8, 128>}, {pipeline_mode = #tpu.pipeline_mode<synchronous>, transform_indices = @transform_2, window_bounds = array<i64: 128, 16>}, {transform_indices = @transform_3, window_bounds = array<i64: 1, 8, 8, 16>}]} {
    %c0 = arith.constant 0 : index
    %c0_0 = arith.constant 0 : index
    %0 = vector.load %arg3[%c0, %c0_0] : memref<8x128xf32, #tpu.memory_space<vmem>>, vector<8x128xf32>
    %c0_1 = arith.constant 0 : index
    %c0_2 = arith.constant 0 : index
    %1 = vector.load %arg4[%c0_1, %c0_2] : memref<128x16xf32, #tpu.memory_space<vmem>>, vector<128x16xf32>
    %c0_3 = arith.constant 0 : index
    %c0_4 = arith.constant 0 : index
    %c0_5 = arith.constant 0 : index
    %c0_6 = arith.constant 0 : index
    %2 = vector.load %arg2[%c0_3, %c0_4, %c0_5, %c0_6] : memref<1x16x64x128xf32, #tpu.memory_space<vmem>>, vector<1x16x8x128xf32>
    %3 = vector.shape_cast %2 : vector<1x16x8x128xf32> to vector<16x8x128xf32>
    %4 = vector.shape_cast %3 : vector<16x8x128xf32> to vector<128x128xf32>
    %cst = arith.constant dense<0.000000e+00> : vector<8x128xf32>
    %5 = tpu.matmul %0, %4, %cst {dimension_numbers = #tpu.dot_dimension_numbers<[1], [0], [0], [1], [0, 0, 1, 1], [], []>} : vector<8x128xf32>, vector<128x128xf32>, vector<8x128xf32> -> vector<8x128xf32>
    %cst_7 = arith.constant dense<0.000000e+00> : vector<8x16xf32>
    %6 = tpu.matmul %5, %1, %cst_7 {dimension_numbers = #tpu.dot_dimension_numbers<[1], [0], [0], [1], [0, 0, 1, 1], [], []>} : vector<8x128xf32>, vector<128x16xf32>, vector<8x16xf32> -> vector<8x16xf32>
    %c0_8 = arith.constant 0 : index
    %c0_9 = arith.constant 0 : index
    %c0_10 = arith.constant 0 : index
    %c0_11 = arith.constant 0 : index
    %7 = vector.load %arg5[%c0_8, %c0_9, %c0_10, %c0_11] : memref<1x8x8x16xf32, #tpu.memory_space<vmem>>, vector<1x1x8x16xf32>
    %8 = vector.shape_cast %7 : vector<1x1x8x16xf32> to vector<8x16xf32>
    %9 = vector.shape_cast %6 : vector<8x16xf32> to vector<1x1x8x16xf32>
    tpu.vector_store %arg5[%c0_8, %c0_9, %c0_10, %c0_11], %9 {strides = array<i32>} : memref<1x8x8x16xf32, #tpu.memory_space<vmem>>, vector<1x1x8x16xf32>,
    %c0_12 = arith.constant 0 : index
    %c0_13 = arith.constant 0 : index
    %c8 = arith.constant 8 : index
    %c0_14 = arith.constant 0 : index
    %10 = vector.load %arg2[%c0_12, %c0_13, %c8, %c0_14] : memref<1x16x64x128xf32, #tpu.memory_space<vmem>>, vector<1x16x8x128xf32>
    %11 = vector.shape_cast %10 : vector<1x16x8x128xf32> to vector<16x8x128xf32>
    %12 = vector.shape_cast %11 : vector<16x8x128xf32> to vector<128x128xf32>
    %cst_15 = arith.constant dense<0.000000e+00> : vector<8x128xf32>
    %13 = tpu.matmul %0, %12, %cst_15 {dimension_numbers = #tpu.dot_dimension_numbers<[1], [0], [0], [1], [0, 0, 1, 1], [], []>} : vector<8x128xf32>, vector<128x128xf32>, vector<8x128xf32> -> vector<8x128xf32>
    %cst_16 = arith.constant dense<0.000000e+00> : vector<8x16xf32>
    %14 = tpu.matmul %13, %1, %cst_16 {dimension_numbers = #tpu.dot_dimension_numbers<[1], [0], [0], [1], [0, 0, 1, 1], [], []>} : vector<8x128xf32>, vector<128x16xf32>, vector<8x16xf32> -> vector<8x16xf32>
    %c0_17 = arith.constant 0 : index
    %c1 = arith.constant 1 : index
    %c0_18 = arith.constant 0 : index
    %c0_19 = arith.constant 0 : index
    %15 = vector.load %arg5[%c0_17, %c1, %c0_18, %c0_19] : memref<1x8x8x16xf32, #tpu.memory_space<vmem>>, vector<1x1x8x16xf32>
    %16 = vector.shape_cast %15 : vector<1x1x8x16xf32> to vector<8x16xf32>
    %17 = vector.shape_cast %14 : vector<8x16xf32> to vector<1x1x8x16xf32>
    tpu.vector_store %arg5[%c0_17, %c1, %c0_18, %c0_19], %17 {strides = array<i32>} : memref<1x8x8x16xf32, #tpu.memory_space<vmem>>, vector<1x1x8x16xf32>,
    %c0_20 = arith.constant 0 : index
    %c0_21 = arith.constant 0 : index
    %c16 = arith.constant 16 : index
    %c0_22 = arith.constant 0 : index
    %18 = vector.load %arg2[%c0_20, %c0_21, %c16, %c0_22] : memref<1x16x64x128xf32, #tpu.memory_space<vmem>>, vector<1x16x8x128xf32>
    %19 = vector.shape_cast %18 : vector<1x16x8x128xf32> to vector<16x8x128xf32>
    %20 = vector.shape_cast %19 : vector<16x8x128xf32> to vector<128x128xf32>
    %cst_23 = arith.constant dense<0.000000e+00> : vector<8x128xf32>
    %21 = tpu.matmul %0, %20, %cst_23 {dimension_numbers = #tpu.dot_dimension_numbers<[1], [0], [0], [1], [0, 0, 1, 1], [], []>} : vector<8x128xf32>, vector<128x128xf32>, vector<8x128xf32> -> vector<8x128xf32>
    %cst_24 = arith.constant dense<0.000000e+00> : vector<8x16xf32>
    %22 = tpu.matmul %21, %1, %cst_24 {dimension_numbers = #tpu.dot_dimension_numbers<[1], [0], [0], [1], [0, 0, 1, 1], [], []>} : vector<8x128xf32>, vector<128x16xf32>, vector<8x16xf32> -> vector<8x16xf32>
    %c0_25 = arith.constant 0 : index
    %c2 = arith.constant 2 : index
    %c0_26 = arith.constant 0 : index
    %c0_27 = arith.constant 0 : index
    %23 = vector.load %arg5[%c0_25, %c2, %c0_26, %c0_27] : memref<1x8x8x16xf32, #tpu.memory_space<vmem>>, vector<1x1x8x16xf32>
    %24 = vector.shape_cast %23 : vector<1x1x8x16xf32> to vector<8x16xf32>
    %25 = vector.shape_cast %22 : vector<8x16xf32> to vector<1x1x8x16xf32>
    tpu.vector_store %arg5[%c0_25, %c2, %c0_26, %c0_27], %25 {strides = array<i32>} : memref<1x8x8x16xf32, #tpu.memory_space<vmem>>, vector<1x1x8x16xf32>,
    %c0_28 = arith.constant 0 : index
    %c0_29 = arith.constant 0 : index
    %c24 = arith.constant 24 : index
    %c0_30 = arith.constant 0 : index
    %26 = vector.load %arg2[%c0_28, %c0_29, %c24, %c0_30] : memref<1x16x64x128xf32, #tpu.memory_space<vmem>>, vector<1x16x8x128xf32>
    %27 = vector.shape_cast %26 : vector<1x16x8x128xf32> to vector<16x8x128xf32>
    %28 = vector.shape_cast %27 : vector<16x8x128xf32> to vector<128x128xf32>
    %cst_31 = arith.constant dense<0.000000e+00> : vector<8x128xf32>
    %29 = tpu.matmul %0, %28, %cst_31 {dimension_numbers = #tpu.dot_dimension_numbers<[1], [0], [0], [1], [0, 0, 1, 1], [], []>} : vector<8x128xf32>, vector<128x128xf32>, vector<8x128xf32> -> vector<8x128xf32>
    %cst_32 = arith.constant dense<0.000000e+00> : vector<8x16xf32>
    %30 = tpu.matmul %29, %1, %cst_32 {dimension_numbers = #tpu.dot_dimension_numbers<[1], [0], [0], [1], [0, 0, 1, 1], [], []>} : vector<8x128xf32>, vector<128x16xf32>, vector<8x16xf32> -> vector<8x16xf32>
    %c0_33 = arith.constant 0 : index
    %c3 = arith.constant 3 : index
    %c0_34 = arith.constant 0 : index
    %c0_35 = arith.constant 0 : index
    %31 = vector.load %arg5[%c0_33, %c3, %c0_34, %c0_35] : memref<1x8x8x16xf32, #tpu.memory_space<vmem>>, vector<1x1x8x16xf32>
    %32 = vector.shape_cast %31 : vector<1x1x8x16xf32> to vector<8x16xf32>
    %33 = vector.shape_cast %30 : vector<8x16xf32> to vector<1x1x8x16xf32>
    tpu.vector_store %arg5[%c0_33, %c3, %c0_34, %c0_35], %33 {strides = array<i32>} : memref<1x8x8x16xf32, #tpu.memory_space<vmem>>, vector<1x1x8x16xf32>,
    %c0_36 = arith.constant 0 : index
    %c0_37 = arith.constant 0 : index
    %c32 = arith.constant 32 : index
    %c0_38 = arith.constant 0 : index
    %34 = vector.load %arg2[%c0_36, %c0_37, %c32, %c0_38] : memref<1x16x64x128xf32, #tpu.memory_space<vmem>>, vector<1x16x8x128xf32>
    %35 = vector.shape_cast %34 : vector<1x16x8x128xf32> to vector<16x8x128xf32>
    %36 = vector.shape_cast %35 : vector<16x8x128xf32> to vector<128x128xf32>
    %cst_39 = arith.constant dense<0.000000e+00> : vector<8x128xf32>
    %37 = tpu.matmul %0, %36, %cst_39 {dimension_numbers = #tpu.dot_dimension_numbers<[1], [0], [0], [1], [0, 0, 1, 1], [], []>} : vector<8x128xf32>, vector<128x128xf32>, vector<8x128xf32> -> vector<8x128xf32>
    %cst_40 = arith.constant dense<0.000000e+00> : vector<8x16xf32>
    %38 = tpu.matmul %37, %1, %cst_40 {dimension_numbers = #tpu.dot_dimension_numbers<[1], [0], [0], [1], [0, 0, 1, 1], [], []>} : vector<8x128xf32>, vector<128x16xf32>, vector<8x16xf32> -> vector<8x16xf32>
    %c0_41 = arith.constant 0 : index
    %c4 = arith.constant 4 : index
    %c0_42 = arith.constant 0 : index
    %c0_43 = arith.constant 0 : index
    %39 = vector.load %arg5[%c0_41, %c4, %c0_42, %c0_43] : memref<1x8x8x16xf32, #tpu.memory_space<vmem>>, vector<1x1x8x16xf32>
    %40 = vector.shape_cast %39 : vector<1x1x8x16xf32> to vector<8x16xf32>
    %41 = vector.shape_cast %38 : vector<8x16xf32> to vector<1x1x8x16xf32>
    tpu.vector_store %arg5[%c0_41, %c4, %c0_42, %c0_43], %41 {strides = array<i32>} : memref<1x8x8x16xf32, #tpu.memory_space<vmem>>, vector<1x1x8x16xf32>,
    %c0_44 = arith.constant 0 : index
    %c0_45 = arith.constant 0 : index
    %c40 = arith.constant 40 : index
    %c0_46 = arith.constant 0 : index
    %42 = vector.load %arg2[%c0_44, %c0_45, %c40, %c0_46] : memref<1x16x64x128xf32, #tpu.memory_space<vmem>>, vector<1x16x8x128xf32>
    %43 = vector.shape_cast %42 : vector<1x16x8x128xf32> to vector<16x8x128xf32>
    %44 = vector.shape_cast %43 : vector<16x8x128xf32> to vector<128x128xf32>
    %cst_47 = arith.constant dense<0.000000e+00> : vector<8x128xf32>
    %45 = tpu.matmul %0, %44, %cst_47 {dimension_numbers = #tpu.dot_dimension_numbers<[1], [0], [0], [1], [0, 0, 1, 1], [], []>} : vector<8x128xf32>, vector<128x128xf32>, vector<8x128xf32> -> vector<8x128xf32>
    %cst_48 = arith.constant dense<0.000000e+00> : vector<8x16xf32>
    %46 = tpu.matmul %45, %1, %cst_48 {dimension_numbers = #tpu.dot_dimension_numbers<[1], [0], [0], [1], [0, 0, 1, 1], [], []>} : vector<8x128xf32>, vector<128x16xf32>, vector<8x16xf32> -> vector<8x16xf32>
    %c0_49 = arith.constant 0 : index
    %c5 = arith.constant 5 : index
    %c0_50 = arith.constant 0 : index
    %c0_51 = arith.constant 0 : index
    %47 = vector.load %arg5[%c0_49, %c5, %c0_50, %c0_51] : memref<1x8x8x16xf32, #tpu.memory_space<vmem>>, vector<1x1x8x16xf32>
    %48 = vector.shape_cast %47 : vector<1x1x8x16xf32> to vector<8x16xf32>
    %49 = vector.shape_cast %46 : vector<8x16xf32> to vector<1x1x8x16xf32>
    tpu.vector_store %arg5[%c0_49, %c5, %c0_50, %c0_51], %49 {strides = array<i32>} : memref<1x8x8x16xf32, #tpu.memory_space<vmem>>, vector<1x1x8x16xf32>,
    %c0_52 = arith.constant 0 : index
    %c0_53 = arith.constant 0 : index
    %c48 = arith.constant 48 : index
    %c0_54 = arith.constant 0 : index
    %50 = vector.load %arg2[%c0_52, %c0_53, %c48, %c0_54] : memref<1x16x64x128xf32, #tpu.memory_space<vmem>>, vector<1x16x8x128xf32>
    %51 = vector.shape_cast %50 : vector<1x16x8x128xf32> to vector<16x8x128xf32>
    %52 = vector.shape_cast %51 : vector<16x8x128xf32> to vector<128x128xf32>
    %cst_55 = arith.constant dense<0.000000e+00> : vector<8x128xf32>
    %53 = tpu.matmul %0, %52, %cst_55 {dimension_numbers = #tpu.dot_dimension_numbers<[1], [0], [0], [1], [0, 0, 1, 1], [], []>} : vector<8x128xf32>, vector<128x128xf32>, vector<8x128xf32> -> vector<8x128xf32>
    %cst_56 = arith.constant dense<0.000000e+00> : vector<8x16xf32>
    %54 = tpu.matmul %53, %1, %cst_56 {dimension_numbers = #tpu.dot_dimension_numbers<[1], [0], [0], [1], [0, 0, 1, 1], [], []>} : vector<8x128xf32>, vector<128x16xf32>, vector<8x16xf32> -> vector<8x16xf32>
    %c0_57 = arith.constant 0 : index
    %c6 = arith.constant 6 : index
    %c0_58 = arith.constant 0 : index
    %c0_59 = arith.constant 0 : index
    %55 = vector.load %arg5[%c0_57, %c6, %c0_58, %c0_59] : memref<1x8x8x16xf32, #tpu.memory_space<vmem>>, vector<1x1x8x16xf32>
    %56 = vector.shape_cast %55 : vector<1x1x8x16xf32> to vector<8x16xf32>
    %57 = vector.shape_cast %54 : vector<8x16xf32> to vector<1x1x8x16xf32>
    tpu.vector_store %arg5[%c0_57, %c6, %c0_58, %c0_59], %57 {strides = array<i32>} : memref<1x8x8x16xf32, #tpu.memory_space<vmem>>, vector<1x1x8x16xf32>,
    %c0_60 = arith.constant 0 : index
    %c0_61 = arith.constant 0 : index
    %c56 = arith.constant 56 : index
    %c0_62 = arith.constant 0 : index
    %58 = vector.load %arg2[%c0_60, %c0_61, %c56, %c0_62] : memref<1x16x64x128xf32, #tpu.memory_space<vmem>>, vector<1x16x8x128xf32>
    %59 = vector.shape_cast %58 : vector<1x16x8x128xf32> to vector<16x8x128xf32>
    %60 = vector.shape_cast %59 : vector<16x8x128xf32> to vector<128x128xf32>
    %cst_63 = arith.constant dense<0.000000e+00> : vector<8x128xf32>
    %61 = tpu.matmul %0, %60, %cst_63 {dimension_numbers = #tpu.dot_dimension_numbers<[1], [0], [0], [1], [0, 0, 1, 1], [], []>} : vector<8x128xf32>, vector<128x128xf32>, vector<8x128xf32> -> vector<8x128xf32>
    %cst_64 = arith.constant dense<0.000000e+00> : vector<8x16xf32>
    %62 = tpu.matmul %61, %1, %cst_64 {dimension_numbers = #tpu.dot_dimension_numbers<[1], [0], [0], [1], [0, 0, 1, 1], [], []>} : vector<8x128xf32>, vector<128x16xf32>, vector<8x16xf32> -> vector<8x16xf32>
    %c0_65 = arith.constant 0 : index
    %c7 = arith.constant 7 : index
    %c0_66 = arith.constant 0 : index
    %c0_67 = arith.constant 0 : index
    %63 = vector.load %arg5[%c0_65, %c7, %c0_66, %c0_67] : memref<1x8x8x16xf32, #tpu.memory_space<vmem>>, vector<1x1x8x16xf32>
    %64 = vector.shape_cast %63 : vector<1x1x8x16xf32> to vector<8x16xf32>
    %65 = vector.shape_cast %62 : vector<8x16xf32> to vector<1x1x8x16xf32>
    tpu.vector_store %arg5[%c0_65, %c7, %c0_66, %c0_67], %65 {strides = array<i32>} : memref<1x8x8x16xf32, #tpu.memory_space<vmem>>, vector<1x1x8x16xf32>,
    return
  }
  func.func @transform_0(%arg0: i32, %arg1: i32) -> (i32, i32, i32, i32) {
    %c0_i32 = arith.constant 0 : i32
    %c0_i32_0 = arith.constant 0 : i32
    %c0_i32_1 = arith.constant 0 : i32
    return %arg0, %c0_i32, %arg1, %c0_i32_0 : i32, i32, i32, i32
  }
  func.func @transform_1(%arg0: i32, %arg1: i32) -> (i32, i32) {
    %c0_i32 = arith.constant 0 : i32
    %c0_i32_0 = arith.constant 0 : i32
    %c0_i32_1 = arith.constant 0 : i32
    return %c0_i32, %c0_i32_0 : i32, i32
  }
  func.func @transform_2(%arg0: i32, %arg1: i32) -> (i32, i32) {
    %c0_i32 = arith.constant 0 : i32
    %c0_i32_0 = arith.constant 0 : i32
    %c0_i32_1 = arith.constant 0 : i32
    return %c0_i32, %c0_i32_0 : i32, i32
  }
  func.func @transform_3(%arg0: i32, %arg1: i32) -> (i32, i32, i32, i32) {
    %c0_i32 = arith.constant 0 : i32
    %c0_i32_0 = arith.constant 0 : i32
    %c0_i32_1 = arith.constant 0 : i32
    return %arg0, %arg1, %c0_i32, %c0_i32_0 : i32, i32, i32, i32
  }
}

</mosaic_0001>

<bundles_post_ra>
// kernel: spp_branch_forward.3
= control target key start
LH: loop header
LB: loop body
LE: loop exit
PB: predicated region body
PF: predicated region fallthrough
CT: control target
= control target key end

     0   :  { %vm40_vm0 = vcmask 130048   ;;  %s1019_s0 = inlined_call_operand.vmem [shape: f32[2,16,8,16], index: 0, kind: input, shape index: {}]   ;;  %s1020_s1 = inlined_call_operand.vmem [shape: f32[2,16,8,16], index: 1, kind: output, shape index: {}]  }
   0x1   :  { %v374_v0 = vld [vmem:[%s1019_s0] sm:$0xff]  ;;  %v379_v1 = vld [vmem:[%s1019_s0 + $0x8] sm:$0xff]  ;;  %v384_v2 = vld [vmem:[%s1019_s0 + $0x10] sm:$0xff] }
   0x2   :  { %v389_v3 = vld [vmem:[%s1019_s0 + $0x18] sm:$0xff]  ;;  %v41_v4 = vsel %vm40_vm0, %v374_v0, 0.0  ;;  %v42_v5 = vsel %vm40_vm0, %v379_v1, 0.0  ;;  %v44_v6 = vsel %vm40_vm0, %v384_v2, 0.0  ;;  %v400_v7 = vld [vmem:[%s1019_s0 + $0x20] sm:$0xff]  ;;  %v407_v10 = vld [vmem:[%s1019_s0 + $0x28] sm:$0xff] }
   0x3   :  { %v43_v8 = vadd.f32 %v42_v5, %v41_v4  ;;  %v46_v9 = vsel %vm40_vm0, %v389_v3, 0.0  ;;  %v48_v12 = vsel %vm40_vm0, %v400_v7, 0.0  ;;  %v414_v13 = vld [vmem:[%s1019_s0 + $0x30] sm:$0xff]  ;;  %v50_v15 = vsel %vm40_vm0, %v407_v10, 0.0  ;;  %v421_v16 = vld [vmem:[%s1019_s0 + $0x38] sm:$0xff]  ;;  %v428_v19 = vld [vmem:[%s1019_s0 + $0x40] sm:$0xff] }
   0x4   :  { %v52_v18 = vsel %vm40_vm0, %v414_v13, 0.0  ;;  %v54_v21 = vsel %vm40_vm0, %v421_v16, 0.0  ;;  %v435_v22 = vld [vmem:[%s1019_s0 + $0x48] sm:$0xff]  ;;  %v56_v24 = vsel %vm40_vm0, %v428_v19, 0.0  ;;  %v442_v25 = vld [vmem:[%s1019_s0 + $0x50] sm:$0xff]  ;;  %v449_v28 = vld [vmem:[%s1019_s0 + $0x58] sm:$0xff] }
   0x5   :  { %v45_v11 = vadd.f32 %v44_v6, %v43_v8  ;;  %v58_v27 = vsel %vm40_vm0, %v435_v22, 0.0  ;;  %v60_v30 = vsel %vm40_vm0, %v442_v25, 0.0  ;;  %v456_v31 = vld [vmem:[%s1019_s0 + $0x60] sm:$0xff]  ;;  %v62_v33 = vsel %vm40_vm0, %v449_v28, 0.0  ;;  %v463_v34 = vld [vmem:[%s1019_s0 + $0x68] sm:$0xff]  ;;  %v470_v37 = vld [vmem:[%s1019_s0 + $0x70] sm:$0xff] }
   0x6   :  { %v64_v36 = vsel %vm40_vm0, %v456_v31, 0.0  ;;  %v66_v39 = vsel %vm40_vm0, %v463_v34, 0.0  ;;  %v477_v40 = vld [vmem:[%s1019_s0 + $0x78] sm:$0xff]  ;;  %v68_v42 = vsel %vm40_vm0, %v470_v37, 0.0  ;;  %v484_v43 = vld [vmem:[%s1019_s0 + $0x80] sm:$0xff]  ;;  %v491_v46 = vld [vmem:[%s1019_s0 + $0x88] sm:$0xff] }
   0x7   :  { %v47_v14 = vadd.f32 %v46_v9, %v45_v11  ;;  %v70_v45 = vsel %vm40_vm0, %v477_v40, 0.0  ;;  %v72_v48 = vsel %vm40_vm0, %v484_v43, 0.0  ;;  %v498_v49 = vld [vmem:[%s1019_s0 + $0x90] sm:$0xff]  ;;  %v74_v51 = vsel %vm40_vm0, %v491_v46, 0.0  ;;  %v505_v52 = vld [vmem:[%s1019_s0 + $0x98] sm:$0xff]  ;;  %v512_v55 = vld [vmem:[%s1019_s0 + $0xa0] sm:$0xff] }
   0x8   :  { %v76_v54 = vsel %vm40_vm0, %v498_v49, 0.0  ;;  %v78_v57 = vsel %vm40_vm0, %v505_v52, 0.0  ;;  %v519_v58 = vld [vmem:[%s1019_s0 + $0xa8] sm:$0xff]  ;;  %v80_v60 = vsel %vm40_vm0, %v512_v55, 0.0  ;;  %v526_v61 = vld [vmem:[%s1019_s0 + $0xb0] sm:$0xff]  ;;  %v533_v4 = vld [vmem:[%s1019_s0 + $0xb8] sm:$0xff] }
   0x9   :  { %v49_v17 = vadd.f32 %v48_v12, %v47_v14  ;;  %v82_v63 = vsel %vm40_vm0, %v519_v58, 0.0  ;;  %v84_v6 = vsel %vm40_vm0, %v526_v61, 0.0  ;;  %v540_v8 = vld [vmem:[%s1019_s0 + $0xc0] sm:$0xff]  ;;  %v86_v11 = vsel %vm40_vm0, %v533_v4, 0.0  ;;  %v547_v12 = vld [vmem:[%s1019_s0 + $0xc8] sm:$0xff] }
   0xb   :  { %v51_v20 = vadd.f32 %v50_v15, %v49_v17  ;;  %v88_v15 = vsel %vm40_vm0, %v540_v8, 0.0  ;;  %v554_v17 = vld [vmem:[%s1019_s0 + $0xd0] sm:$0xff] }
   0xd   :  { %v53_v23 = vadd.f32 %v52_v18, %v51_v20  ;;  %v90_v20 = vsel %vm40_vm0, %v547_v12, 0.0 }
   0xf   :  { %v55_v26 = vadd.f32 %v54_v21, %v53_v23  ;;  %v561_v21 = vld [vmem:[%s1019_s0 + $0xd8] sm:$0xff] }
  0x11   :  { %v57_v29 = vadd.f32 %v56_v24, %v55_v26  ;;  %v92_v24 = vsel %vm40_vm0, %v554_v17, 0.0  ;;  %v568_v26 = vld [vmem:[%s1019_s0 + $0xe0] sm:$0xff] }
  0x13   :  { %v59_v32 = vadd.f32 %v58_v27, %v57_v29  ;;  %v94_v29 = vsel %vm40_vm0, %v561_v21, 0.0 }
  0x15   :  { %v61_v35 = vadd.f32 %v60_v30, %v59_v32  ;;  %v575_v30 = vld [vmem:[%s1019_s0 + $0xe8] sm:$0xff] }
  0x17   :  { %v63_v38 = vadd.f32 %v62_v33, %v61_v35  ;;  %v96_v33 = vsel %vm40_vm0, %v568_v26, 0.0  ;;  %v582_v35 = vld [vmem:[%s1019_s0 + $0xf0] sm:$0xff] }
  0x19   :  { %v65_v41 = vadd.f32 %v64_v36, %v63_v38  ;;  %v98_v38 = vsel %vm40_vm0, %v575_v30, 0.0 }
  0x1b   :  { %v67_v44 = vadd.f32 %v66_v39, %v65_v41  ;;  %v589_v39 = vld [vmem:[%s1019_s0 + $0xf8] sm:$0xff] }
  0x1d   :  { %v69_v47 = vadd.f32 %v68_v42, %v67_v44  ;;  %v100_v42 = vsel %vm40_vm0, %v582_v35, 0.0 }
  0x1f   :  { %v71_v50 = vadd.f32 %v70_v45, %v69_v47  ;;  %v102_v45 = vsel %vm40_vm0, %v589_v39, 0.0 }
  0x21   :  { %v73_v53 = vadd.f32 %v72_v48, %v71_v50  ;;  %v360_v50 = vmov 512.0  }
  0x22   :  { %356 = vrcp.f32 %v360_v50 }
  0x23   :  { %v75_v56 = vadd.f32 %v74_v51, %v73_v53 }
  0x25   :  { %v77_v59 = vadd.f32 %v76_v54, %v75_v56 }
  0x27   :  { %v79_v62 = vadd.f32 %v78_v57, %v77_v59 }
  0x28   :  { %v357_v51 = vpop.eup %356 }
  0x29   :  { %v81_v5 = vadd.f32 %v80_v60, %v79_v62  ;;  %v107_v53 = vmul.f32 512.0, %v357_v51  ;;  %vm111_vm1 = vweird.f32 %v357_v51 }
  0x2b   :  { %v83_v9 = vadd.f32 %v82_v63, %v81_v5  ;;  %v108_v54 = vsub.f32 1.0, %v107_v53 }
  0x2d   :  { %v85_v14 = vadd.f32 %v84_v6, %v83_v9  ;;  %v109_v56 = vmul.f32 %v357_v51, %v108_v54 }
  0x2f   :  { %v87_v18 = vadd.f32 %v86_v11, %v85_v14  ;;  %v110_v57 = vadd.f32 %v357_v51, %v109_v56 }
  0x31   :  { %v89_v23 = vadd.f32 %v88_v15, %v87_v18  ;;  %v595_v60 = vsel %vm111_vm1, %v357_v51, %v110_v57 }
  0x33   :  { %v91_v27 = vadd.f32 %v90_v20, %v89_v23 }
  0x35   :  { %v93_v32 = vadd.f32 %v92_v24, %v91_v27 }
  0x37   :  { %v95_v36 = vadd.f32 %v94_v29, %v93_v32 }
  0x39   :  { %v97_v41 = vadd.f32 %v96_v33, %v95_v36 }
  0x3b   :  { %v99_v44 = vadd.f32 %v98_v38, %v97_v41 }
  0x3d   :  { %v101_v47 = vadd.f32 %v100_v42, %v99_v44 }
  0x3f   :  { %v103_v48 = vadd.f32 %v102_v45, %v101_v47 }
  0x41   :  { %104 = vadd.xlane.f32.xlu0 %v103_v48 }
  0xb4   :  { %v105_v59 = vpop.xlane.xlu0 %104 }
  0xb5   :  { %v598_v62 = vmul.f32 %v595_v60, %v105_v59 }
  0xb7   :  { %v602_v63 = vsub.f32 %v374_v0, %v598_v62  ;;  %v606_v5 = vsub.f32 %v379_v1, %v598_v62  ;;  %v610_v6 = vsub.f32 %v384_v2, %v598_v62  ;;  %v614_v9 = vsub.f32 %v389_v3, %v598_v62 }
  0xb8   :  { %v622_v0 = vsub.f32 %v400_v7, %v598_v62  ;;  %v628_v2 = vsub.f32 %v407_v10, %v598_v62  ;;  %v636_v23 = vsub.f32 %v414_v13, %v598_v62  ;;  %v643_v10 = vsub.f32 %v421_v16, %v598_v62 }
  0xb9   :  { %v146_v11 = vmul.f32 %v602_v63, %v602_v63  ;;  %v147_v14 = vmul.f32 %v606_v5, %v606_v5  ;;  %v148_v1 = vmul.f32 %v610_v6, %v610_v6  ;;  %v149_v3 = vmul.f32 %v614_v9, %v614_v9 }
  0xba   :  { %v150_v7 = vmul.f32 %v622_v0, %v622_v0  ;;  %v151_v29 = vmul.f32 %v628_v2, %v628_v2  ;;  %v650_v13 = vsub.f32 %v428_v19, %v598_v62  ;;  %v152_v36 = vmul.f32 %v636_v23, %v636_v23 }
  0xbb   :  { %v178_v15 = vsel %vm40_vm0, %v146_v11, 0.0  ;;  %v179_v18 = vsel %vm40_vm0, %v147_v14, 0.0  ;;  %v181_v24 = vsel %vm40_vm0, %v148_v1, 0.0  ;;  %v183_v32 = vsel %vm40_vm0, %v149_v3, 0.0 }
  0xbc   :  { %v180_v20 = vadd.f32 %v179_v18, %v178_v15  ;;  %v185_v38 = vsel %vm40_vm0, %v150_v7, 0.0  ;;  %v657_v16 = vsub.f32 %v435_v22, %v598_v62  ;;  %v153_v42 = vmul.f32 %v643_v10, %v643_v10 }
  0xbd   :  { %v187_v44 = vsel %vm40_vm0, %v151_v29, 0.0  ;;  %v664_v19 = vsub.f32 %v442_v25, %v598_v62  ;;  %v154_v47 = vmul.f32 %v650_v13, %v650_v13  ;;  %v189_v48 = vsel %vm40_vm0, %v152_v36, 0.0 }
  0xbe   :  { %v182_v27 = vadd.f32 %v181_v24, %v180_v20  ;;  %v671_v22 = vsub.f32 %v449_v28, %v598_v62  ;;  %v155_v51 = vmul.f32 %v657_v16, %v657_v16  ;;  %v191_v53 = vsel %vm40_vm0, %v153_v42, 0.0 }
  0xbf   :  { %v678_v25 = vsub.f32 %v456_v31, %v598_v62  ;;  %v156_v56 = vmul.f32 %v664_v19, %v664_v19  ;;  %v193_v57 = vsel %vm40_vm0, %v154_v47, 0.0  ;;  %v685_v28 = vsub.f32 %v463_v34, %v598_v62 }
  0xc0   :  { %v184_v33 = vadd.f32 %v183_v32, %v182_v27  ;;  %v157_v11 = vmul.f32 %v671_v22, %v671_v22  ;;  %v195_v14 = vsel %vm40_vm0, %v155_v51, 0.0  ;;  %v692_v31 = vsub.f32 %v470_v37, %v598_v62 }
  0xc1   :  { %v158_v3 = vmul.f32 %v678_v25, %v678_v25  ;;  %v197_v15 = vsel %vm40_vm0, %v156_v56, 0.0  ;;  %v699_v34 = vsub.f32 %v477_v40, %v598_v62  ;;  %v159_v20 = vmul.f32 %v685_v28, %v685_v28 }
  0xc2   :  { %v186_v41 = vadd.f32 %v185_v38, %v184_v33  ;;  %v199_v7 = vsel %vm40_vm0, %v157_v11, 0.0  ;;  %v706_v37 = vsub.f32 %v484_v43, %v598_v62  ;;  %v160_v27 = vmul.f32 %v692_v31, %v692_v31 }
  0xc3   :  { %v201_v29 = vsel %vm40_vm0, %v158_v3, 0.0  ;;  %v713_v40 = vsub.f32 %v491_v46, %v598_v62  ;;  %v161_v33 = vmul.f32 %v699_v34, %v699_v34  ;;  %v203_v36 = vsel %vm40_vm0, %v159_v20, 0.0 }
  0xc4   :  { %v188_v45 = vadd.f32 %v187_v44, %v186_v41  ;;  %v720_v43 = vsub.f32 %v498_v49, %v598_v62  ;;  %v162_v41 = vmul.f32 %v706_v37, %v706_v37  ;;  %v205_v42 = vsel %vm40_vm0, %v160_v27, 0.0 }
  0xc5   :  { %v727_v46 = vsub.f32 %v505_v52, %v598_v62  ;;  %v207_v47 = vsel %vm40_vm0, %v161_v33, 0.0  ;;  %v734_v49 = vsub.f32 %v512_v55, %v598_v62  ;;  %v741_v52 = vsub.f32 %v519_v58, %v598_v62 }
  0xc6   :  { %v190_v50 = vadd.f32 %v189_v48, %v188_v45  ;;  %v163_v45 = vmul.f32 %v713_v40, %v713_v40  ;;  %v209_v51 = vsel %vm40_vm0, %v162_v41, 0.0  ;;  %v748_v55 = vsub.f32 %v526_v61, %v598_v62 }
  0xc7   :  { %v755_v58 = vsub.f32 %v533_v4, %v598_v62  ;;  %v762_v61 = vsub.f32 %v540_v8, %v598_v62  ;;  %v769_v4 = vsub.f32 %v547_v12, %v598_v62  ;;  %v776_v8 = vsub.f32 %v554_v17, %v598_v62 }
  0xc8   :  { %v192_v54 = vadd.f32 %v191_v53, %v190_v50  ;;  %v164_v50 = vmul.f32 %v720_v43, %v720_v43  ;;  %v211_v56 = vsel %vm40_vm0, %v163_v45, 0.0  ;;  %v783_v12 = vsub.f32 %v561_v21, %v598_v62 }
  0xc9   :  { %v790_v17 = vsub.f32 %v568_v26, %v598_v62  ;;  %v797_v21 = vsub.f32 %v575_v30, %v598_v62  ;;  %v804_v26 = vsub.f32 %v582_v35, %v598_v62  ;;  %v811_v30 = vsub.f32 %v589_v39, %v598_v62 }
  0xca   :  { %v194_v59 = vadd.f32 %v193_v57, %v192_v54  ;;  %v165_v54 = vmul.f32 %v727_v46, %v727_v46  ;;  %v213_v11 = vsel %vm40_vm0, %v164_v50, 0.0 }
  0xcb   :  { %v176_v35 = vmul.f32 %v804_v26, %v804_v26 }
  0xcc   :  { %v196_v1 = vadd.f32 %v195_v14, %v194_v59  ;;  %v166_v59 = vmul.f32 %v734_v49, %v734_v49  ;;  %v215_v3 = vsel %vm40_vm0, %v165_v54, 0.0 }
  0xcd   :  { %v237_v39 = vsel %vm40_vm0, %v176_v35, 0.0 }
  0xce   :  { %v198_v18 = vadd.f32 %v197_v15, %v196_v1  ;;  %v167_v1 = vmul.f32 %v741_v52, %v741_v52  ;;  %v217_v20 = vsel %vm40_vm0, %v166_v59, 0.0 }
  0xd0   :  { %v200_v24 = vadd.f32 %v199_v7, %v198_v18  ;;  %v168_v18 = vmul.f32 %v748_v55, %v748_v55  ;;  %v219_v27 = vsel %vm40_vm0, %v167_v1, 0.0 }
  0xd2   :  { %v202_v32 = vadd.f32 %v201_v29, %v200_v24  ;;  %v169_v24 = vmul.f32 %v755_v58, %v755_v58  ;;  %v221_v33 = vsel %vm40_vm0, %v168_v18, 0.0 }
  0xd4   :  { %v204_v38 = vadd.f32 %v203_v36, %v202_v32  ;;  %v170_v32 = vmul.f32 %v762_v61, %v762_v61  ;;  %v223_v41 = vsel %vm40_vm0, %v169_v24, 0.0 }
  0xd6   :  { %v206_v44 = vadd.f32 %v205_v42, %v204_v38  ;;  %v171_v38 = vmul.f32 %v769_v4, %v769_v4  ;;  %v225_v45 = vsel %vm40_vm0, %v170_v32, 0.0 }
  0xd8   :  { %v208_v48 = vadd.f32 %v207_v47, %v206_v44  ;;  %v172_v44 = vmul.f32 %v776_v8, %v776_v8  ;;  %v227_v50 = vsel %vm40_vm0, %v171_v38, 0.0 }
  0xda   :  { %v210_v53 = vadd.f32 %v209_v51, %v208_v48  ;;  %v173_v48 = vmul.f32 %v783_v12, %v783_v12  ;;  %v229_v54 = vsel %vm40_vm0, %v172_v44, 0.0 }
  0xdc   :  { %v212_v57 = vadd.f32 %v211_v56, %v210_v53  ;;  %v174_v53 = vmul.f32 %v790_v17, %v790_v17  ;;  %v231_v59 = vsel %vm40_vm0, %v173_v48, 0.0 }
  0xde   :  { %v214_v14 = vadd.f32 %v213_v11, %v212_v57  ;;  %v175_v57 = vmul.f32 %v797_v21, %v797_v21 }
  0xe0   :  { %v216_v15 = vadd.f32 %v215_v3, %v214_v14  ;;  %v233_v14 = vsel %vm40_vm0, %v174_v53, 0.0  ;;  %v177_v3 = vmul.f32 %v811_v30, %v811_v30 }
  0xe2   :  { %v218_v7 = vadd.f32 %v217_v20, %v216_v15  ;;  %v235_v15 = vsel %vm40_vm0, %v175_v57, 0.0  ;;  %v239_v20 = vsel %vm40_vm0, %v177_v3, 0.0 }
  0xe4   :  { %v220_v29 = vadd.f32 %v219_v27, %v218_v7 }
  0xe6   :  { %v222_v36 = vadd.f32 %v221_v33, %v220_v29 }
  0xe8   :  { %v224_v42 = vadd.f32 %v223_v41, %v222_v36 }
  0xea   :  { %v226_v47 = vadd.f32 %v225_v45, %v224_v42 }
  0xec   :  { %v228_v51 = vadd.f32 %v227_v50, %v226_v47 }
  0xee   :  { %v230_v56 = vadd.f32 %v229_v54, %v228_v51 }
  0xf0   :  { %v232_v11 = vadd.f32 %v231_v59, %v230_v56 }
  0xf2   :  { %v234_v1 = vadd.f32 %v233_v14, %v232_v11 }
  0xf4   :  { %v236_v18 = vadd.f32 %v235_v15, %v234_v1 }
  0xf6   :  { %v238_v62 = vadd.f32 %v237_v39, %v236_v18 }
  0xf8   :  { %v240_v7 = vadd.f32 %v239_v20, %v238_v62 }
  0xfa   :  { %241 = vadd.xlane.f32.xlu0 %v240_v7 }
 0x16d   :  { %v242_v24 = vpop.xlane.xlu0 %241 }
 0x16e   :  { %v243_v27 = vmul.f32 %v242_v24, %v595_v60 }
 0x170   :  { %v244_v29 = vadd.f32 1e-05, %v243_v27 }
 0x172   :  { %358 = vrsqrt.f32 %v244_v29  ;;  %vm251_vm3 = vweird.f32 %v244_v29 }
 0x178   :  { %v359_v32 = vpop.eup %358 }
 0x179   :  { %v246_v33 = vmul.f32 %v359_v32, %v244_v29  ;;  %vm252_vm2 = vweird.f32 %v359_v32 }
 0x17a   :  { %vm253_vm4 = vmor %vm251_vm3, %vm252_vm2 }
 0x17b   :  { %v247_v36 = vmul.f32 %v359_v32, %v246_v33 }
 0x17d   :  { %v248_v38 = vmul.f32 0.5, %v247_v36 }
 0x17f   :  { %v249_v41 = vsub.f32 1.5, %v248_v38 }
 0x181   :  { %v250_v42 = vmul.f32 %v359_v32, %v249_v41 }
 0x183   :  { %v825_v44 = vsel %vm253_vm4, %v359_v32, %v250_v42 }
 0x184   :  { %v255_v45 = vmul.f32 %v825_v44, %v602_v63  ;;  %v256_v47 = vmul.f32 %v825_v44, %v606_v5  ;;  %v257_v60 = vmul.f32 %v825_v44, %v610_v6  ;;  %v258_v48 = vmul.f32 %v825_v44, %v614_v9 }
 0x185   :  { %v259_v50 = vmul.f32 %v825_v44, %v622_v0  ;;  %v260_v51 = vmul.f32 %v825_v44, %v628_v2  ;;  %v261_v53 = vmul.f32 %v825_v44, %v636_v23  ;;  %v262_v5 = vmul.f32 %v825_v44, %v643_v10 }
 0x186   :  { %v287_v54 = vmax.f32 %v255_v45, 0.0  ;;  %v288_v63 = vmax.f32 %v256_v47, 0.0  ;;  %v289_v56 = vmax.f32 %v257_v60, 0.0  ;;  %v290_v57 = vmax.f32 %v258_v48, 0.0 }
 0x187   :  { %v263_v6 = vmul.f32 %v825_v44, %v650_v13  ;;  %v291_v9 = vmax.f32 %v259_v50, 0.0  ;;  %v264_v0 = vmul.f32 %v825_v44, %v657_v16  ;;  %v292_v2 = vmax.f32 %v260_v51, 0.0 }
 0x188   :  { %319 = vst.msk [vmem:[%s1020_s1] sm:$0xff] %vm40_vm0, %v287_v54  ;;  %v265_v23 = vmul.f32 %v825_v44, %v664_v19  ;;  %v293_v10 = vmax.f32 %v261_v53, 0.0  ;;  %v266_v13 = vmul.f32 %v825_v44, %v671_v22  ;;  %v294_v59 = vmax.f32 %v262_v5, 0.0 }
 0x189   :  { %320 = vst.msk [vmem:[%s1020_s1 + $0x8] sm:$0xff] %vm40_vm0, %v288_v63  ;;  %v267_v16 = vmul.f32 %v825_v44, %v678_v25  ;;  %v295_v11 = vmax.f32 %v263_v6, 0.0  ;;  %v268_v19 = vmul.f32 %v825_v44, %v685_v28  ;;  %v296_v35 = vmax.f32 %v264_v0, 0.0 }
 0x18a   :  { %321 = vst.msk [vmem:[%s1020_s1 + $0x10] sm:$0xff] %vm40_vm0, %v289_v56  ;;  %v269_v22 = vmul.f32 %v825_v44, %v692_v31  ;;  %v297_v14 = vmax.f32 %v265_v23, 0.0  ;;  %v270_v25 = vmul.f32 %v825_v44, %v699_v34  ;;  %v298_v1 = vmax.f32 %v266_v13, 0.0 }
 0x18b   :  { %322 = vst.msk [vmem:[%s1020_s1 + $0x18] sm:$0xff] %vm40_vm0, %v290_v57  ;;  %v271_v28 = vmul.f32 %v825_v44, %v706_v37  ;;  %v299_v3 = vmax.f32 %v267_v16, 0.0  ;;  %v272_v31 = vmul.f32 %v825_v44, %v713_v40  ;;  %v300_v15 = vmax.f32 %v268_v19, 0.0 }
 0x18c   :  { %323 = vst.msk [vmem:[%s1020_s1 + $0x20] sm:$0xff] %vm40_vm0, %v291_v9  ;;  %v273_v34 = vmul.f32 %v825_v44, %v720_v43  ;;  %v301_v18 = vmax.f32 %v269_v22, 0.0  ;;  %v274_v37 = vmul.f32 %v825_v44, %v727_v46  ;;  %v302_v39 = vmax.f32 %v270_v25, 0.0 }
 0x18d   :  { %324 = vst.msk [vmem:[%s1020_s1 + $0x28] sm:$0xff] %vm40_vm0, %v292_v2  ;;  %v275_v40 = vmul.f32 %v825_v44, %v734_v49  ;;  %v303_v62 = vmax.f32 %v271_v28, 0.0  ;;  %v276_v43 = vmul.f32 %v825_v44, %v741_v52  ;;  %v304_v20 = vmax.f32 %v272_v31, 0.0 }
 0x18e   :  { %325 = vst.msk [vmem:[%s1020_s1 + $0x30] sm:$0xff] %vm40_vm0, %v293_v10  ;;  %v277_v46 = vmul.f32 %v825_v44, %v748_v55  ;;  %v305_v7 = vmax.f32 %v273_v34, 0.0  ;;  %v278_v49 = vmul.f32 %v825_v44, %v755_v58  ;;  %v306_v24 = vmax.f32 %v274_v37, 0.0 }
 0x18f   :  { %326 = vst.msk [vmem:[%s1020_s1 + $0x38] sm:$0xff] %vm40_vm0, %v294_v59  ;;  %v279_v52 = vmul.f32 %v825_v44, %v762_v61  ;;  %v307_v27 = vmax.f32 %v275_v40, 0.0  ;;  %v280_v55 = vmul.f32 %v825_v44, %v769_v4  ;;  %v308_v29 = vmax.f32 %v276_v43, 0.0 }
 0x190   :  { %327 = vst.msk [vmem:[%s1020_s1 + $0x40] sm:$0xff] %vm40_vm0, %v295_v11  ;;  %v281_v58 = vmul.f32 %v825_v44, %v776_v8  ;;  %v309_v32 = vmax.f32 %v277_v46, 0.0  ;;  %v282_v61 = vmul.f32 %v825_v44, %v783_v12  ;;  %v310_v33 = vmax.f32 %v278_v49, 0.0 }
 0x191   :  { %328 = vst.msk [vmem:[%s1020_s1 + $0x48] sm:$0xff] %vm40_vm0, %v296_v35  ;;  %v283_v4 = vmul.f32 %v825_v44, %v790_v17  ;;  %v311_v36 = vmax.f32 %v279_v52, 0.0  ;;  %v284_v8 = vmul.f32 %v825_v44, %v797_v21  ;;  %v312_v38 = vmax.f32 %v280_v55, 0.0 }
 0x192   :  { %329 = vst.msk [vmem:[%s1020_s1 + $0x50] sm:$0xff] %vm40_vm0, %v297_v14  ;;  %v285_v12 = vmul.f32 %v825_v44, %v804_v26  ;;  %v313_v41 = vmax.f32 %v281_v58, 0.0  ;;  %v286_v17 = vmul.f32 %v825_v44, %v811_v30  ;;  %v314_v42 = vmax.f32 %v282_v61, 0.0 }
 0x193   :  { %330 = vst.msk [vmem:[%s1020_s1 + $0x58] sm:$0xff] %vm40_vm0, %v298_v1  ;;  %v315_v21 = vmax.f32 %v283_v4, 0.0  ;;  %v316_v26 = vmax.f32 %v284_v8, 0.0 }
 0x194   :  { %331 = vst.msk [vmem:[%s1020_s1 + $0x60] sm:$0xff] %vm40_vm0, %v299_v3  ;;  %v317_v45 = vmax.f32 %v285_v12, 0.0  ;;  %v318_v30 = vmax.f32 %v286_v17, 0.0 }
 0x195   :  { %332 = vst.msk [vmem:[%s1020_s1 + $0x68] sm:$0xff] %vm40_vm0, %v300_v15 }
 0x196   :  { %333 = vst.msk [vmem:[%s1020_s1 + $0x70] sm:$0xff] %vm40_vm0, %v301_v18 }
 0x197   :  { %334 = vst.msk [vmem:[%s1020_s1 + $0x78] sm:$0xff] %vm40_vm0, %v302_v39 }
 0x198   :  { %335 = vst.msk [vmem:[%s1020_s1 + $0x80] sm:$0xff] %vm40_vm0, %v303_v62 }
 0x199   :  { %336 = vst.msk [vmem:[%s1020_s1 + $0x88] sm:$0xff] %vm40_vm0, %v304_v20 }
 0x19a   :  { %337 = vst.msk [vmem:[%s1020_s1 + $0x90] sm:$0xff] %vm40_vm0, %v305_v7 }
 0x19b   :  { %338 = vst.msk [vmem:[%s1020_s1 + $0x98] sm:$0xff] %vm40_vm0, %v306_v24 }
 0x19c   :  { %339 = vst.msk [vmem:[%s1020_s1 + $0xa0] sm:$0xff] %vm40_vm0, %v307_v27 }
 0x19d   :  { %340 = vst.msk [vmem:[%s1020_s1 + $0xa8] sm:$0xff] %vm40_vm0, %v308_v29 }
 0x19e   :  { %341 = vst.msk [vmem:[%s1020_s1 + $0xb0] sm:$0xff] %vm40_vm0, %v309_v32 }
 0x19f   :  { %342 = vst.msk [vmem:[%s1020_s1 + $0xb8] sm:$0xff] %vm40_vm0, %v310_v33 }
 0x1a0   :  { %343 = vst.msk [vmem:[%s1020_s1 + $0xc0] sm:$0xff] %vm40_vm0, %v311_v36 }
 0x1a1   :  { %344 = vst.msk [vmem:[%s1020_s1 + $0xc8] sm:$0xff] %vm40_vm0, %v312_v38 }
 0x1a2   :  { %345 = vst.msk [vmem:[%s1020_s1 + $0xd0] sm:$0xff] %vm40_vm0, %v313_v41 }
 0x1a3   :  { %346 = vst.msk [vmem:[%s1020_s1 + $0xd8] sm:$0xff] %vm40_vm0, %v314_v42 }
 0x1a4   :  { %347 = vst.msk [vmem:[%s1020_s1 + $0xe0] sm:$0xff] %vm40_vm0, %v315_v21 }
 0x1a5   :  { %348 = vst.msk [vmem:[%s1020_s1 + $0xe8] sm:$0xff] %vm40_vm0, %v316_v26 }
 0x1a6   :  { %349 = vst.msk [vmem:[%s1020_s1 + $0xf0] sm:$0xff] %vm40_vm0, %v317_v45 }
 0x1a7   :  { %350 = vst.msk [vmem:[%s1020_s1 + $0xf8] sm:$0xff] %vm40_vm0, %v318_v30 }

// kernel: spp_branch_forward.2
= control target key start
LH: loop header
LB: loop body
LE: loop exit
PB: predicated region body
PF: predicated region fallthrough
CT: control target
= control target key end

     0   :  { %8 = vsyncpa [#allocation3], 0  ;;  %s1505_s0 = inlined_call_operand.hbm [shape: f32[2,16,128,128], index: 0, kind: input, shape index: {}]   ;;  %s1506_s1 = inlined_call_operand.vmem [shape: f32[8,128], index: 1, kind: input, shape index: {}]   ;;  %s1507_s2 = inlined_call_operand.vmem [shape: f32[128,16], index: 2, kind: input, shape index: {}]   ;;  %s1508_s3 = inlined_call_operand.vmem [shape: f32[2,16,8,16], index: 3, kind: output, shape index: {}]  }
   0x1   :  { %10 = vsyncpa [#allocation3 + $0x1], 0  ;;  %s1020_s12 = smov 0   ;;  %s1022_s13 = smov 0  }
   0x2   :  { %s1024_s14 = smov 0   ;;  %s1026_s15 = smov 0  }
   0x3   :  { %s1028_s16 = smov 0   ;;  %s1030_s17 = smov 0  }
   0x4   :  { %s1032_s18 = smov 0   ;;  %s1034_s19 = smov 0  }
   0x5 LB: > { %s25_s20 = sadd.s32 1, %s985_s17  ;;  %s28_s21 = sadd.s32 1, %s989_s18  ;;  %s993_s19 = sphi %s1034_s19, %s16_s19   ;;  %s989_s18 = sphi %s1032_s18, %s1520_s18   ;;  %s985_s17 = sphi %s1030_s17, %s1519_s17   ;;  %s981_s16 = sphi %s1028_s16, %s1518_s16   ;;  %s977_s15 = sphi %s1026_s15, %s1517_s15   ;;  %s973_s14 = sphi %s1024_s14, %s1516_s14   ;;  %s969_s13 = sphi %s1022_s13, %s1515_s13   ;;  %s965_s12 = sphi %s1020_s12, %s1514_s12  }
   0x6   : > { %p26_p0 = scmp.ge.s32.totalorder %s25_s20, 2  ;;  %s825_s22 = sadd.s32 4294967295, %s993_s19  }
   0x7   : > { %p44_p1 = scmp.ne.s32.totalorder %s973_s14, %s969_s13  ;;  %p45_p2 = scmp.eq.s32.totalorder %s993_s19, 0 }
   0x8   : > { %s1522_s20 = smov (%p26_p0, %s25_s20), 0  ;;  %s1524_s21 = smov (!%p26_p0, %s28_s21), %s989_s18 }
   0x9   : > { %s33_s23 = ssub.s32 %s985_s17, %s1522_s20  ;;  %p30_p3 = scmp.ge.s32.totalorder %s1524_s21, 2 }
   0xa   : > { %p50_p4 = scmp.ne.s32.totalorder %s969_s13, %s965_s12  ;;  %p1070_p5 = por %p45_p2, %p44_p1 }
   0xb   : > { %p51_p6 = scmp.eq.s32.totalorder %s825_s22, 0  ;;  %s1526_s21 = smov (%p30_p3, %s1524_s21), 0 }
   0xc   : > { %1511 = sst [smem:[#allocation8_spill]] %s1526_s21  ;;  %s32_s26 = ssub.s32 %s989_s18, %s1526_s21 }
   0xd   : > { %p1076_p7 = por %p51_p6, %p50_p4  ;;  %s34_s27 = sor.u32 %s33_s23, %s32_s26 }
   0xe   : > { %s37_s28 = sadd.s32 1, %s973_s14  ;;  %p35_p8 = scmp.eq.s32.totalorder %s34_s27, 0 }
   0xf   : > { %p828_p9 = scmp.ge.s32.totalorder %s993_s19, 4 }
  0x10   : > { %s1084_s29 = scalar_select %p35_p8, %s973_s14, %s37_s28  }
  0x11   : > { %146 = sbr.rel (%p828_p9) target bundleno = 38 (0x26), region = 24 }
  0x16   : > { %s150_s30 = sand.u32 1, %s973_s14   ;;  %s830_s4 = sshll.u32 %s985_s17, 3 }
  0x17   : > { %s829_s5 = sshll.u32 %s150_s30, 10  ;;  %s831_s6 = sshll.u32 %s989_s18, 8 }
  0x18   : > { %s159_s7 = sadd.s32 %s831_s6, %s830_s4  ;;  %s154_s22 = scalar_lea.vmem [#allocation2], %s829_s5 }
  0x19   : > { %s832_s8 = sshll.u32 %s159_s7, 3  ;;  %s176_s23 = sshll.u32 %s154_s22, 4  ;;  %s177_s23 = int_to_ptr.vmem [resolvable:$true] %s176_s23 }
  0x1a   : > { %s161_s11 = scalar_lea.hbm %s1505_s0, %s832_s8  ;;  %s995_s26 = smov 2048  }
  0x1b   : > { %s849_s12 = scalar_select %p1070_p5, [#allocation0], [#allocation6] }
  0x1c   : > { %850 = sst [smem:[#allocation5]] (%p1070_p5), %s995_s26  ;;  %s174_s28 = sshll.u32 %s161_s11, 4  ;;  %s175_s28 = int_to_ptr.hbm [resolvable:$true] %s174_s28 }
  0x1d   : > { %s166_s27 = sld [smem:[%s849_s12]]   ;;  %s996_s21 = smov 1024  }
  0x1e   : > { %851 = sst [smem:[#allocation5 + $0x1]] (%p1070_p5), %s996_s21  ;;  %s997_s4 = smov 8  }
  0x1f   : > { %852 = sst [smem:[#allocation5 + $0x2]] (%p1070_p5), %s997_s4  ;;  %s998_s6 = smov 128  }
  0x20   : > { %853 = sst [smem:[#allocation5 + $0x3]] (%p1070_p5), %s998_s6  ;;  %s151_s8 = scalar_lea.sflag [#allocation3], %s150_s30 }
  0x21   : > { %854 = sst [smem:[#allocation5 + $0x4]] (%p1070_p5), %s998_s6  ;;  %s999_s9 = smov [#allocation4]  }
  0x22   : > { %855 = sst [smem:[#allocation5 + $0x5]] (%p1070_p5), %s997_s4 }
  0x23   : > { %s833_s5 = sshll.u32 %s166_s27, 26 }
  0x24   : > { %s834_s7 = sadd.s32 134217728, %s833_s5 }
  0x25   : > { %856 = dma.general (%p1070_p5), %s175_s28, 16384, %s177_s23, %s151_s8, %s999_s9, [#allocation5], %s834_s7, 0  }
  0x26 PF: > { %p835_p10 = scmp.ge.s32.totalorder %s993_s19, 1  ;;  %p197_p11 = scmp.lt.s32.totalorder %s993_s19, 5 }
  0x28   : > { %p198_p12 = pnand %p835_p10, %p197_p11 }
  0x29   : > { %s203_s21 = sand.u32 (!%p198_p12), 1, %s969_s13  }
  0x2a   : > { %201 = sbr.rel (%p198_p12) target bundleno = 441 (0x1b9), region = 32  ;;  %s836_s10 = sshll.u32 (!%p198_p12), %s203_s21, 10 }
  0x2b   : > { %s204_s11 = scalar_lea.sflag (!%p198_p12), [#allocation3], %s203_s21  ;;  %s1112_s12 = scalar_lea.vmem (!%p198_p12), [#allocation2], %s836_s10 }
  0x2f   : > { %960 = dma.done.wait (%p1076_p7), %s204_s11, 16384  }
  0x30   : > { %962 = vsyncadd (%p1076_p7), %s204_s11, 4294950912  ;;  %v336_v0 = vld [vmem:[%s1112_s12 + $0x3c8] sm:$0xff]  ;;  %v278_v3 = vld [vmem:[%s1112_s12 + $0x3c0] sm:$0xff]  ;;  %p237_p13 = scmp.lt.s32.totalorder %s981_s16, 1  ;;  %vm319_vm0 = vcmask 130048  }
  0x31   : > { %v335_v1 = vld [vmem:[%s1112_s12 + $0x388] sm:$0xff]  ;;  %337 = vmatpush.msra.mxu2 %v336_v0  ;;  %v277_v4 = vld [vmem:[%s1112_s12 + $0x380] sm:$0xff]  ;;  %279 = vmatpush.msra.mxu0 %v278_v3  ;;  %v452_v31 = vld [vmem:[%s1112_s12 + $0x3d8] sm:$0xff] }
  0x32   : > { %v334_v2 = vld [vmem:[%s1112_s12 + $0x348] sm:$0xff]  ;;  %v276_v6 = vld [vmem:[%s1112_s12 + $0x340] sm:$0xff]  ;;  %v451_v34 = vld [vmem:[%s1112_s12 + $0x398] sm:$0xff]  ;;  %s1528_s16 = smov (!%p237_p13, %s981_s16), 1 }
  0x33   : > { %338 = vmatpush.msra.mxu2 %v335_v1  ;;  %v333_v5 = vld [vmem:[%s1112_s12 + $0x308] sm:$0xff]  ;;  %280 = vmatpush.msra.mxu0 %v277_v4  ;;  %v275_v8 = vld [vmem:[%s1112_s12 + $0x300] sm:$0xff]  ;;  %v394_v35 = vld [vmem:[%s1112_s12 + $0x3d0] sm:$0xff]  ;;  %s838_s24 = sshll.u32 %s1528_s16, 4 }
  0x34   : > { %v332_v7 = vld [vmem:[%s1112_s12 + $0x2c8] sm:$0xff]  ;;  %v274_v10 = vld [vmem:[%s1112_s12 + $0x2c0] sm:$0xff]  ;;  %v450_v36 = vld [vmem:[%s1112_s12 + $0x358] sm:$0xff] }
  0x35   : > { %339 = vmatpush.msra.mxu2 %v334_v2  ;;  %281 = vmatpush.msra.mxu0 %v276_v6  ;;  %v331_v9 = vld [vmem:[%s1112_s12 + $0x288] sm:$0xff]  ;;  %v273_v12 = vld [vmem:[%s1112_s12 + $0x280] sm:$0xff]  ;;  %v393_v37 = vld [vmem:[%s1112_s12 + $0x390] sm:$0xff] }
  0x36   : > { %v330_v11 = vld [vmem:[%s1112_s12 + $0x248] sm:$0xff]  ;;  %v272_v14 = vld [vmem:[%s1112_s12 + $0x240] sm:$0xff]  ;;  %v449_v38 = vld [vmem:[%s1112_s12 + $0x318] sm:$0xff] }
  0x37   : > { %340 = vmatpush.msra.mxu2 %v333_v5  ;;  %282 = vmatpush.msra.mxu0 %v275_v8  ;;  %v329_v13 = vld [vmem:[%s1112_s12 + $0x208] sm:$0xff]  ;;  %v271_v16 = vld [vmem:[%s1112_s12 + $0x200] sm:$0xff]  ;;  %v392_v39 = vld [vmem:[%s1112_s12 + $0x350] sm:$0xff] }
  0x38   : > { %v328_v15 = vld [vmem:[%s1112_s12 + $0x1c8] sm:$0xff]  ;;  %v270_v18 = vld [vmem:[%s1112_s12 + $0x1c0] sm:$0xff]  ;;  %v448_v40 = vld [vmem:[%s1112_s12 + $0x2d8] sm:$0xff] }
  0x39   : > { %341 = vmatpush.msra.mxu2 %v332_v7  ;;  %283 = vmatpush.msra.mxu0 %v274_v10  ;;  %v327_v17 = vld [vmem:[%s1112_s12 + $0x188] sm:$0xff]  ;;  %v269_v20 = vld [vmem:[%s1112_s12 + $0x180] sm:$0xff]  ;;  %v391_v41 = vld [vmem:[%s1112_s12 + $0x310] sm:$0xff] }
  0x3a   : > { %v326_v19 = vld [vmem:[%s1112_s12 + $0x148] sm:$0xff]  ;;  %v268_v22 = vld [vmem:[%s1112_s12 + $0x140] sm:$0xff]  ;;  %v447_v42 = vld [vmem:[%s1112_s12 + $0x298] sm:$0xff] }
  0x3b   : > { %342 = vmatpush.msra.mxu2 %v331_v9  ;;  %284 = vmatpush.msra.mxu0 %v273_v12  ;;  %v325_v21 = vld [vmem:[%s1112_s12 + $0x108] sm:$0xff]  ;;  %v267_v24 = vld [vmem:[%s1112_s12 + $0x100] sm:$0xff]  ;;  %v390_v43 = vld [vmem:[%s1112_s12 + $0x2d0] sm:$0xff] }
  0x3c   : > { %v324_v23 = vld [vmem:[%s1112_s12 + $0xc8] sm:$0xff]  ;;  %v266_v26 = vld [vmem:[%s1112_s12 + $0xc0] sm:$0xff]  ;;  %v446_v44 = vld [vmem:[%s1112_s12 + $0x258] sm:$0xff] }
  0x3d   : > { %343 = vmatpush.msra.mxu2 %v330_v11  ;;  %285 = vmatpush.msra.mxu0 %v272_v14  ;;  %v323_v25 = vld [vmem:[%s1112_s12 + $0x88] sm:$0xff]  ;;  %v265_v28 = vld [vmem:[%s1112_s12 + $0x80] sm:$0xff]  ;;  %v389_v45 = vld [vmem:[%s1112_s12 + $0x290] sm:$0xff] }
  0x3e   : > { %v322_v27 = vld [vmem:[%s1112_s12 + $0x48] sm:$0xff]  ;;  %v264_v30 = vld [vmem:[%s1112_s12 + $0x40] sm:$0xff]  ;;  %v445_v46 = vld [vmem:[%s1112_s12 + $0x218] sm:$0xff] }
  0x3f   : > { %344 = vmatpush.msra.mxu2 %v329_v13  ;;  %286 = vmatpush.msra.mxu0 %v271_v16  ;;  %v321_v29 = vld [vmem:[%s1112_s12 + $0x8] sm:$0xff]  ;;  %v263_v32 = vld [vmem:[%s1112_s12] sm:$0xff]  ;;  %v388_v47 = vld [vmem:[%s1112_s12 + $0x250] sm:$0xff] }
  0x40   : > { %v1154_v33 = vld [vmem:[%s1506_s1] sm:$0xff]  ;;  %v444_v48 = vld [vmem:[%s1112_s12 + $0x1d8] sm:$0xff]  ;;  %v387_v49 = vld [vmem:[%s1112_s12 + $0x210] sm:$0xff] }
  0x41   : > { %345 = vmatpush.msra.mxu2 %v328_v15  ;;  %287 = vmatpush.msra.mxu0 %v270_v18  ;;  %v443_v50 = vld [vmem:[%s1112_s12 + $0x198] sm:$0xff]  ;;  %v386_v51 = vld [vmem:[%s1112_s12 + $0x1d0] sm:$0xff]  ;;  %v568_v0 = vld [vmem:[%s1112_s12 + $0x3e8] sm:$0xff] }
  0x42   : > { %v442_v52 = vld [vmem:[%s1112_s12 + $0x158] sm:$0xff]  ;;  %v385_v53 = vld [vmem:[%s1112_s12 + $0x190] sm:$0xff]  ;;  %v567_v2 = vld [vmem:[%s1112_s12 + $0x3a8] sm:$0xff] }
  0x43   : > { %346 = vmatpush.msra.mxu2 %v327_v17  ;;  %288 = vmatpush.msra.mxu0 %v269_v20  ;;  %v441_v54 = vld [vmem:[%s1112_s12 + $0x118] sm:$0xff]  ;;  %v384_v55 = vld [vmem:[%s1112_s12 + $0x150] sm:$0xff]  ;;  %v510_v3 = vld [vmem:[%s1112_s12 + $0x3e0] sm:$0xff] }
  0x44   : > { %v440_v56 = vld [vmem:[%s1112_s12 + $0xd8] sm:$0xff]  ;;  %v383_v57 = vld [vmem:[%s1112_s12 + $0x110] sm:$0xff]  ;;  %v566_v4 = vld [vmem:[%s1112_s12 + $0x368] sm:$0xff] }
  0x45   : > { %347 = vmatpush.msra.mxu2 %v326_v19  ;;  %289 = vmatpush.msra.mxu0 %v268_v22  ;;  %v439_v58 = vld [vmem:[%s1112_s12 + $0x98] sm:$0xff]  ;;  %v382_v59 = vld [vmem:[%s1112_s12 + $0xd0] sm:$0xff]  ;;  %v509_v5 = vld [vmem:[%s1112_s12 + $0x3a0] sm:$0xff] }
  0x46   : > { %v438_v60 = vld [vmem:[%s1112_s12 + $0x58] sm:$0xff]  ;;  %v381_v61 = vld [vmem:[%s1112_s12 + $0x90] sm:$0xff]  ;;  %v565_v6 = vld [vmem:[%s1112_s12 + $0x328] sm:$0xff] }
  0x47   : > { %348 = vmatpush.msra.mxu2 %v325_v21  ;;  %290 = vmatpush.msra.mxu0 %v267_v24  ;;  %v437_v62 = vld [vmem:[%s1112_s12 + $0x18] sm:$0xff]  ;;  %v380_v63 = vld [vmem:[%s1112_s12 + $0x50] sm:$0xff]  ;;  %v508_v7 = vld [vmem:[%s1112_s12 + $0x360] sm:$0xff] }
  0x48   : > { %v379_v1 = vld [vmem:[%s1112_s12 + $0x10] sm:$0xff]  ;;  %v564_v8 = vld [vmem:[%s1112_s12 + $0x2e8] sm:$0xff]  ;;  %v507_v9 = vld [vmem:[%s1112_s12 + $0x320] sm:$0xff] }
  0x49   : > { %349 = vmatpush.msra.mxu2 %v324_v23  ;;  %291 = vmatpush.msra.mxu0 %v266_v26  ;;  %v563_v10 = vld [vmem:[%s1112_s12 + $0x2a8] sm:$0xff]  ;;  %v506_v11 = vld [vmem:[%s1112_s12 + $0x2e0] sm:$0xff] }
  0x4a   : > { %v562_v12 = vld [vmem:[%s1112_s12 + $0x268] sm:$0xff]  ;;  %v505_v13 = vld [vmem:[%s1112_s12 + $0x2a0] sm:$0xff] }
  0x4b   : > { %350 = vmatpush.msra.mxu2 %v323_v25  ;;  %292 = vmatpush.msra.mxu0 %v265_v28  ;;  %v561_v14 = vld [vmem:[%s1112_s12 + $0x228] sm:$0xff]  ;;  %v504_v15 = vld [vmem:[%s1112_s12 + $0x260] sm:$0xff] }
  0x4c   : > { %v560_v16 = vld [vmem:[%s1112_s12 + $0x1e8] sm:$0xff]  ;;  %v503_v17 = vld [vmem:[%s1112_s12 + $0x220] sm:$0xff] }
  0x4d   : > { %351 = vmatpush.msra.mxu2 %v322_v27  ;;  %293 = vmatpush.msra.mxu0 %v264_v30  ;;  %v559_v18 = vld [vmem:[%s1112_s12 + $0x1a8] sm:$0xff]  ;;  %v502_v19 = vld [vmem:[%s1112_s12 + $0x1e0] sm:$0xff] }
  0x4e   : > { %v558_v20 = vld [vmem:[%s1112_s12 + $0x168] sm:$0xff]  ;;  %v501_v21 = vld [vmem:[%s1112_s12 + $0x1a0] sm:$0xff] }
  0x4f   : > { %352 = vmatpush.msra.mxu2 %v321_v29  ;;  %294 = vmatpush.msra.mxu0 %v263_v32  ;;  %v557_v22 = vld [vmem:[%s1112_s12 + $0x128] sm:$0xff]  ;;  %v500_v23 = vld [vmem:[%s1112_s12 + $0x160] sm:$0xff]  ;;  %v684_v32 = vld [vmem:[%s1112_s12 + $0x3f8] sm:$0xff] }
  0x50   : > { %353 = vmatmul.f32.vlgmr.msra.gmra.mxu2 %v1154_v33  ;;  %295 = vmatmul.f32.vlgmr.msra.gmra.mxu0 %v1154_v33  ;;  %v556_v24 = vld [vmem:[%s1112_s12 + $0xe8] sm:$0xff]  ;;  %v499_v25 = vld [vmem:[%s1112_s12 + $0x120] sm:$0xff] }
  0x51   : > { %453 = vmatpush.msrb.mxu2 %v452_v31  ;;  %395 = vmatpush.msrb.mxu0 %v394_v35  ;;  %v555_v26 = vld [vmem:[%s1112_s12 + $0xa8] sm:$0xff]  ;;  %v498_v27 = vld [vmem:[%s1112_s12 + $0xe0] sm:$0xff]  ;;  %v683_v35 = vld [vmem:[%s1112_s12 + $0x3b8] sm:$0xff] }
  0x52   : > { %v554_v28 = vld [vmem:[%s1112_s12 + $0x68] sm:$0xff]  ;;  %v497_v29 = vld [vmem:[%s1112_s12 + $0xa0] sm:$0xff] }
  0x53   : > { %454 = vmatpush.msrb.mxu2 %v451_v34  ;;  %396 = vmatpush.msrb.mxu0 %v393_v37  ;;  %v553_v30 = vld [vmem:[%s1112_s12 + $0x28] sm:$0xff]  ;;  %v496_v31 = vld [vmem:[%s1112_s12 + $0x60] sm:$0xff]  ;;  %v1229_v37 = vld [vmem:[%s1507_s2 + $0x78] sm:$0xff] }
  0x54   : > { %v495_v34 = vld [vmem:[%s1112_s12 + $0x20] sm:$0xff]  ;;  %357 = vmatpush.msra.mxu3 %v1229_v37  ;;  %299 = vmatpush.msra.mxu1 %v1229_v37 }
  0x55   : > { %455 = vmatpush.msrb.mxu2 %v450_v36  ;;  %397 = vmatpush.msrb.mxu0 %v392_v39  ;;  %v626_v36 = vld [vmem:[%s1112_s12 + $0x3f0] sm:$0xff] }
  0x56   : > { %v625_v39 = vld [vmem:[%s1112_s12 + $0x3b0] sm:$0xff] }
  0x57   : > { %456 = vmatpush.msrb.mxu2 %v449_v38  ;;  %398 = vmatpush.msrb.mxu0 %v391_v41  ;;  %v682_v38 = vld [vmem:[%s1112_s12 + $0x378] sm:$0xff] }
  0x58   : > { %v681_v41 = vld [vmem:[%s1112_s12 + $0x338] sm:$0xff] }
  0x59   : > { %457 = vmatpush.msrb.mxu2 %v448_v40  ;;  %399 = vmatpush.msrb.mxu0 %v390_v43  ;;  %v1237_v40 = vld [vmem:[%s1507_s2 + $0x70] sm:$0xff]  ;;  %v1246_v43 = vld [vmem:[%s1507_s2 + $0x68] sm:$0xff] }
  0x5a   : > { %358 = vmatpush.msra.mxu3 %v1237_v40  ;;  %300 = vmatpush.msra.mxu1 %v1237_v40 }
  0x5b   : > { %458 = vmatpush.msrb.mxu2 %v447_v42  ;;  %400 = vmatpush.msrb.mxu0 %v389_v45  ;;  %v624_v42 = vld [vmem:[%s1112_s12 + $0x370] sm:$0xff] }
  0x5c   : > { %v623_v45 = vld [vmem:[%s1112_s12 + $0x330] sm:$0xff]  ;;  %359 = vmatpush.msra.mxu3 %v1246_v43  ;;  %301 = vmatpush.msra.mxu1 %v1246_v43 }
  0x5d   : > { %459 = vmatpush.msrb.mxu2 %v446_v44  ;;  %401 = vmatpush.msrb.mxu0 %v388_v47  ;;  %v680_v44 = vld [vmem:[%s1112_s12 + $0x2f8] sm:$0xff] }
  0x5e   : > { %v679_v47 = vld [vmem:[%s1112_s12 + $0x2b8] sm:$0xff] }
  0x5f   : > { %460 = vmatpush.msrb.mxu2 %v445_v46  ;;  %402 = vmatpush.msrb.mxu0 %v387_v49  ;;  %v1255_v46 = vld [vmem:[%s1507_s2 + $0x60] sm:$0xff]  ;;  %v1264_v49 = vld [vmem:[%s1507_s2 + $0x58] sm:$0xff] }
  0x60   : > { %360 = vmatpush.msra.mxu3 %v1255_v46  ;;  %302 = vmatpush.msra.mxu1 %v1255_v46 }
  0x61   : > { %461 = vmatpush.msrb.mxu2 %v444_v48  ;;  %403 = vmatpush.msrb.mxu0 %v386_v51  ;;  %v622_v48 = vld [vmem:[%s1112_s12 + $0x2f0] sm:$0xff] }
  0x62   : > { %v621_v51 = vld [vmem:[%s1112_s12 + $0x2b0] sm:$0xff]  ;;  %361 = vmatpush.msra.mxu3 %v1264_v49  ;;  %303 = vmatpush.msra.mxu1 %v1264_v49 }
  0x63   : > { %462 = vmatpush.msrb.mxu2 %v443_v50  ;;  %404 = vmatpush.msrb.mxu0 %v385_v53  ;;  %v678_v50 = vld [vmem:[%s1112_s12 + $0x278] sm:$0xff] }
  0x64   : > { %v677_v53 = vld [vmem:[%s1112_s12 + $0x238] sm:$0xff] }
  0x65   : > { %463 = vmatpush.msrb.mxu2 %v442_v52  ;;  %405 = vmatpush.msrb.mxu0 %v384_v55  ;;  %v1273_v52 = vld [vmem:[%s1507_s2 + $0x50] sm:$0xff]  ;;  %v1282_v55 = vld [vmem:[%s1507_s2 + $0x48] sm:$0xff] }
  0x66   : > { %362 = vmatpush.msra.mxu3 %v1273_v52  ;;  %304 = vmatpush.msra.mxu1 %v1273_v52 }
  0x67   : > { %464 = vmatpush.msrb.mxu2 %v441_v54  ;;  %406 = vmatpush.msrb.mxu0 %v383_v57  ;;  %v620_v54 = vld [vmem:[%s1112_s12 + $0x270] sm:$0xff] }
  0x68   : > { %v619_v57 = vld [vmem:[%s1112_s12 + $0x230] sm:$0xff]  ;;  %363 = vmatpush.msra.mxu3 %v1282_v55  ;;  %305 = vmatpush.msra.mxu1 %v1282_v55 }
  0x69   : > { %465 = vmatpush.msrb.mxu2 %v440_v56  ;;  %407 = vmatpush.msrb.mxu0 %v382_v59  ;;  %v676_v56 = vld [vmem:[%s1112_s12 + $0x1f8] sm:$0xff] }
  0x6a   : > { %v675_v59 = vld [vmem:[%s1112_s12 + $0x1b8] sm:$0xff] }
  0x6b   : > { %466 = vmatpush.msrb.mxu2 %v439_v58  ;;  %408 = vmatpush.msrb.mxu0 %v381_v61  ;;  %v1291_v58 = vld [vmem:[%s1507_s2 + $0x40] sm:$0xff]  ;;  %v1300_v61 = vld [vmem:[%s1507_s2 + $0x38] sm:$0xff] }
  0x6c   : > { %364 = vmatpush.msra.mxu3 %v1291_v58  ;;  %306 = vmatpush.msra.mxu1 %v1291_v58 }
  0x6d   : > { %467 = vmatpush.msrb.mxu2 %v438_v60  ;;  %409 = vmatpush.msrb.mxu0 %v380_v63  ;;  %v618_v60 = vld [vmem:[%s1112_s12 + $0x1f0] sm:$0xff] }
  0x6e   : > { %v617_v63 = vld [vmem:[%s1112_s12 + $0x1b0] sm:$0xff]  ;;  %365 = vmatpush.msra.mxu3 %v1300_v61  ;;  %307 = vmatpush.msra.mxu1 %v1300_v61 }
  0x6f   : > { %468 = vmatpush.msrb.mxu2 %v437_v62  ;;  %410 = vmatpush.msrb.mxu0 %v379_v1  ;;  %v674_v62 = vld [vmem:[%s1112_s12 + $0x178] sm:$0xff] }
  0x70   : > { %469 = vmatmul.f32.vlgmr.msrb.gmra.mxu2 %v1154_v33  ;;  %411 = vmatmul.f32.vlgmr.msrb.gmra.mxu0 %v1154_v33  ;;  %v673_v1 = vld [vmem:[%s1112_s12 + $0x138] sm:$0xff] }
  0x71   : > { %569 = vmatpush.msra.mxu2 %v568_v0  ;;  %511 = vmatpush.msra.mxu0 %v510_v3  ;;  %v1309_v0 = vld [vmem:[%s1507_s2 + $0x30] sm:$0xff]  ;;  %v1318_v3 = vld [vmem:[%s1507_s2 + $0x28] sm:$0xff] }
  0x72   : > { %366 = vmatpush.msra.mxu3 %v1309_v0  ;;  %308 = vmatpush.msra.mxu1 %v1309_v0 }
  0x73   : > { %570 = vmatpush.msra.mxu2 %v567_v2  ;;  %512 = vmatpush.msra.mxu0 %v509_v5  ;;  %v616_v2 = vld [vmem:[%s1112_s12 + $0x170] sm:$0xff] }
  0x74   : > { %v615_v5 = vld [vmem:[%s1112_s12 + $0x130] sm:$0xff]  ;;  %367 = vmatpush.msra.mxu3 %v1318_v3  ;;  %309 = vmatpush.msra.mxu1 %v1318_v3 }
  0x75   : > { %571 = vmatpush.msra.mxu2 %v566_v4  ;;  %513 = vmatpush.msra.mxu0 %v508_v7  ;;  %v672_v4 = vld [vmem:[%s1112_s12 + $0xf8] sm:$0xff] }
  0x76   : > { %v671_v7 = vld [vmem:[%s1112_s12 + $0xb8] sm:$0xff] }
  0x77   : > { %572 = vmatpush.msra.mxu2 %v565_v6  ;;  %514 = vmatpush.msra.mxu0 %v507_v9  ;;  %v1327_v6 = vld [vmem:[%s1507_s2 + $0x20] sm:$0xff]  ;;  %v1336_v9 = vld [vmem:[%s1507_s2 + $0x18] sm:$0xff] }
  0x78   : > { %368 = vmatpush.msra.mxu3 %v1327_v6  ;;  %310 = vmatpush.msra.mxu1 %v1327_v6 }
  0x79   : > { %573 = vmatpush.msra.mxu2 %v564_v8  ;;  %515 = vmatpush.msra.mxu0 %v506_v11  ;;  %v614_v8 = vld [vmem:[%s1112_s12 + $0xf0] sm:$0xff] }
  0x7a   : > { %v613_v11 = vld [vmem:[%s1112_s12 + $0xb0] sm:$0xff]  ;;  %369 = vmatpush.msra.mxu3 %v1336_v9  ;;  %311 = vmatpush.msra.mxu1 %v1336_v9 }
  0x7b   : > { %574 = vmatpush.msra.mxu2 %v563_v10  ;;  %516 = vmatpush.msra.mxu0 %v505_v13  ;;  %v670_v10 = vld [vmem:[%s1112_s12 + $0x78] sm:$0xff] }
  0x7c   : > { %v669_v13 = vld [vmem:[%s1112_s12 + $0x38] sm:$0xff] }
  0x7d   : > { %575 = vmatpush.msra.mxu2 %v562_v12  ;;  %517 = vmatpush.msra.mxu0 %v504_v15  ;;  %v1345_v12 = vld [vmem:[%s1507_s2 + $0x10] sm:$0xff]  ;;  %v1354_v15 = vld [vmem:[%s1507_s2 + $0x8] sm:$0xff] }
  0x7e   : > { %370 = vmatpush.msra.mxu3 %v1345_v12  ;;  %312 = vmatpush.msra.mxu1 %v1345_v12 }
  0x7f   : > { %576 = vmatpush.msra.mxu2 %v561_v14  ;;  %518 = vmatpush.msra.mxu0 %v503_v17  ;;  %v612_v14 = vld [vmem:[%s1112_s12 + $0x70] sm:$0xff]  ;;  %v1362_v17 = vld [vmem:[%s1507_s2] sm:$0xff] }
  0x80   : > { %371 = vmatpush.msra.mxu3 %v1354_v15  ;;  %313 = vmatpush.msra.mxu1 %v1354_v15 }
  0x81   : > { %577 = vmatpush.msra.mxu2 %v560_v16  ;;  %519 = vmatpush.msra.mxu0 %v502_v19  ;;  %v611_v16 = vld [vmem:[%s1112_s12 + $0x30] sm:$0xff]  ;;  %s837_s12 = sshll.u32 %s977_s15, 3 }
  0x82   : > { %372 = vmatpush.msra.mxu3 %v1362_v17  ;;  %314 = vmatpush.msra.mxu1 %v1362_v17  ;;  %p239_p0 = scmp.lt.s32.totalorder %s837_s12, 15 }
  0x83   : > { %578 = vmatpush.msra.mxu2 %v559_v18  ;;  %520 = vmatpush.msra.mxu0 %v501_v21 }
  0x84   : > { %473 = vmatpush.msrb.mxu3 %v1229_v37  ;;  %415 = vmatpush.msrb.mxu1 %v1229_v37  ;;  %s1530_s12 = smov (!%p239_p0, %s837_s12), 15 }
  0x85   : > { %579 = vmatpush.msra.mxu2 %v558_v20  ;;  %521 = vmatpush.msra.mxu0 %v500_v23  ;;  %s242_s25 = sadd.s32 %s838_s24, %s1530_s12 }
  0x86   : > { %474 = vmatpush.msrb.mxu3 %v1237_v40  ;;  %416 = vmatpush.msrb.mxu1 %v1237_v40  ;;  %s839_s30 = sshll.u32 %s242_s25, 3 }
  0x87   : > { %580 = vmatpush.msra.mxu2 %v557_v22  ;;  %522 = vmatpush.msra.mxu0 %v499_v25  ;;  %s244_s26 = scalar_lea.vmem %s1508_s3, %s839_s30 }
  0x88   : > { %475 = vmatpush.msrb.mxu3 %v1246_v43  ;;  %417 = vmatpush.msrb.mxu1 %v1246_v43 }
  0x89   : > { %581 = vmatpush.msra.mxu2 %v556_v24  ;;  %523 = vmatpush.msra.mxu0 %v498_v27 }
  0x8a   : > { %476 = vmatpush.msrb.mxu3 %v1255_v46  ;;  %418 = vmatpush.msrb.mxu1 %v1255_v46 }
  0x8b   : > { %582 = vmatpush.msra.mxu2 %v555_v26  ;;  %524 = vmatpush.msra.mxu0 %v497_v29 }
  0x8c   : > { %477 = vmatpush.msrb.mxu3 %v1264_v49  ;;  %419 = vmatpush.msrb.mxu1 %v1264_v49 }
  0x8d   : > { %583 = vmatpush.msra.mxu2 %v554_v28  ;;  %525 = vmatpush.msra.mxu0 %v496_v31 }
  0x8e   : > { %478 = vmatpush.msrb.mxu3 %v1273_v52  ;;  %420 = vmatpush.msrb.mxu1 %v1273_v52 }
  0x8f   : > { %584 = vmatpush.msra.mxu2 %v553_v30  ;;  %526 = vmatpush.msra.mxu0 %v495_v34 }
  0x90   : > { %585 = vmatmul.f32.vlgmr.msra.gmra.mxu2 %v1154_v33  ;;  %527 = vmatmul.f32.vlgmr.msra.gmra.mxu0 %v1154_v33 }
  0x91   : > { %685 = vmatpush.msrb.mxu2 %v684_v32  ;;  %627 = vmatpush.msrb.mxu0 %v626_v36 }
  0x92   : > { %479 = vmatpush.msrb.mxu3 %v1282_v55  ;;  %421 = vmatpush.msrb.mxu1 %v1282_v55 }
  0x93   : > { %686 = vmatpush.msrb.mxu2 %v683_v35  ;;  %628 = vmatpush.msrb.mxu0 %v625_v39 }
  0x94   : > { %480 = vmatpush.msrb.mxu3 %v1291_v58  ;;  %422 = vmatpush.msrb.mxu1 %v1291_v58 }
  0x95   : > { %687 = vmatpush.msrb.mxu2 %v682_v38  ;;  %629 = vmatpush.msrb.mxu0 %v624_v42 }
  0x96   : > { %481 = vmatpush.msrb.mxu3 %v1300_v61  ;;  %423 = vmatpush.msrb.mxu1 %v1300_v61 }
  0x97   : > { %688 = vmatpush.msrb.mxu2 %v681_v41  ;;  %630 = vmatpush.msrb.mxu0 %v623_v45 }
  0x98   : > { %482 = vmatpush.msrb.mxu3 %v1309_v0  ;;  %424 = vmatpush.msrb.mxu1 %v1309_v0 }
  0x99   : > { %689 = vmatpush.msrb.mxu2 %v680_v44  ;;  %631 = vmatpush.msrb.mxu0 %v622_v48 }
  0x9a   : > { %483 = vmatpush.msrb.mxu3 %v1318_v3  ;;  %425 = vmatpush.msrb.mxu1 %v1318_v3 }
  0x9b   : > { %690 = vmatpush.msrb.mxu2 %v679_v47  ;;  %632 = vmatpush.msrb.mxu0 %v621_v51 }
  0x9c   : > { %484 = vmatpush.msrb.mxu3 %v1327_v6  ;;  %426 = vmatpush.msrb.mxu1 %v1327_v6 }
  0x9d   : > { %691 = vmatpush.msrb.mxu2 %v678_v50  ;;  %633 = vmatpush.msrb.mxu0 %v620_v54 }
  0x9e   : > { %485 = vmatpush.msrb.mxu3 %v1336_v9  ;;  %427 = vmatpush.msrb.mxu1 %v1336_v9 }
  0x9f   : > { %692 = vmatpush.msrb.mxu2 %v677_v53  ;;  %634 = vmatpush.msrb.mxu0 %v619_v57 }
  0xa0   : > { %486 = vmatpush.msrb.mxu3 %v1345_v12  ;;  %428 = vmatpush.msrb.mxu1 %v1345_v12 }
  0xa1   : > { %693 = vmatpush.msrb.mxu2 %v676_v56  ;;  %635 = vmatpush.msrb.mxu0 %v618_v60 }
  0xa2   : > { %487 = vmatpush.msrb.mxu3 %v1354_v15  ;;  %429 = vmatpush.msrb.mxu1 %v1354_v15 }
  0xa3   : > { %694 = vmatpush.msrb.mxu2 %v675_v59  ;;  %636 = vmatpush.msrb.mxu0 %v617_v63 }
  0xa4   : > { %488 = vmatpush.msrb.mxu3 %v1362_v17  ;;  %430 = vmatpush.msrb.mxu1 %v1362_v17 }
  0xa5   : > { %695 = vmatpush.msrb.mxu2 %v674_v62  ;;  %637 = vmatpush.msrb.mxu0 %v616_v2 }
  0xa7   : > { %696 = vmatpush.msrb.mxu2 %v673_v1  ;;  %638 = vmatpush.msrb.mxu0 %v615_v5 }
  0xa9   : > { %697 = vmatpush.msrb.mxu2 %v672_v4  ;;  %639 = vmatpush.msrb.mxu0 %v614_v8 }
  0xab   : > { %698 = vmatpush.msrb.mxu2 %v671_v7  ;;  %640 = vmatpush.msrb.mxu0 %v613_v11 }
  0xad   : > { %699 = vmatpush.msrb.mxu2 %v670_v10  ;;  %641 = vmatpush.msrb.mxu0 %v612_v14 }
  0xaf   : > { %700 = vmatpush.msrb.mxu2 %v669_v13  ;;  %642 = vmatpush.msrb.mxu0 %v611_v16 }
  0xb0   : > { %701 = vmatmul.f32.vlgmr.msrb.gmra.mxu2 %v1154_v33  ;;  %643 = vmatmul.f32.vlgmr.msrb.gmra.mxu0 %v1154_v33 }
  0xcd   : > { %v296_v33 = vpop.f32.mrf.mxu0 }
  0xce   : > { %315 = vmatmul.f32.vlgmr.msra.gmra.mxu1 %v296_v33 }
  0xcf   : > { %531 = vmatpush.msra.mxu1 %v1229_v37 }
  0xd1   : > { %532 = vmatpush.msra.mxu1 %v1237_v40 }
  0xd3   : > { %v354_v18 = vpop.f32.mrf.mxu2  ;;  %533 = vmatpush.msra.mxu1 %v1246_v43 }
  0xd4   : > { %373 = vmatmul.f32.vlgmr.msra.gmra.mxu3 %v354_v18 }
  0xd5   : > { %589 = vmatpush.msra.mxu3 %v1229_v37  ;;  %534 = vmatpush.msra.mxu1 %v1255_v46 }
  0xd7   : > { %590 = vmatpush.msra.mxu3 %v1237_v40  ;;  %535 = vmatpush.msra.mxu1 %v1264_v49 }
  0xd9   : > { %591 = vmatpush.msra.mxu3 %v1246_v43  ;;  %536 = vmatpush.msra.mxu1 %v1273_v52 }
  0xdb   : > { %592 = vmatpush.msra.mxu3 %v1255_v46  ;;  %537 = vmatpush.msra.mxu1 %v1282_v55 }
  0xdd   : > { %593 = vmatpush.msra.mxu3 %v1264_v49  ;;  %538 = vmatpush.msra.mxu1 %v1291_v58 }
  0xdf   : > { %594 = vmatpush.msra.mxu3 %v1273_v52  ;;  %539 = vmatpush.msra.mxu1 %v1300_v61 }
  0xe1   : > { %595 = vmatpush.msra.mxu3 %v1282_v55  ;;  %540 = vmatpush.msra.mxu1 %v1309_v0 }
  0xe3   : > { %596 = vmatpush.msra.mxu3 %v1291_v58  ;;  %541 = vmatpush.msra.mxu1 %v1318_v3 }
  0xe5   : > { %597 = vmatpush.msra.mxu3 %v1300_v61  ;;  %542 = vmatpush.msra.mxu1 %v1327_v6 }
  0xe7   : > { %598 = vmatpush.msra.mxu3 %v1309_v0  ;;  %543 = vmatpush.msra.mxu1 %v1336_v9 }
  0xe9   : > { %599 = vmatpush.msra.mxu3 %v1318_v3  ;;  %544 = vmatpush.msra.mxu1 %v1345_v12 }
  0xeb   : > { %600 = vmatpush.msra.mxu3 %v1327_v6  ;;  %545 = vmatpush.msra.mxu1 %v1354_v15 }
  0xed   : > { %601 = vmatpush.msra.mxu3 %v1336_v9  ;;  %v412_v19 = vpop.f32.mrf.mxu0  ;;  %546 = vmatpush.msra.mxu1 %v1362_v17 }
  0xee   : > { %431 = vmatmul.f32.vlgmr.msrb.gmra.mxu1 %v412_v19 }
  0xef   : > { %602 = vmatpush.msra.mxu3 %v1345_v12  ;;  %647 = vmatpush.msrb.mxu1 %v1229_v37 }
  0xf1   : > { %603 = vmatpush.msra.mxu3 %v1354_v15  ;;  %648 = vmatpush.msrb.mxu1 %v1237_v40 }
  0xf3   : > { %v470_v20 = vpop.f32.mrf.mxu2  ;;  %604 = vmatpush.msra.mxu3 %v1362_v17  ;;  %649 = vmatpush.msrb.mxu1 %v1246_v43 }
  0xf4   : > { %489 = vmatmul.f32.vlgmr.msrb.gmra.mxu3 %v470_v20 }
  0xf5   : > { %705 = vmatpush.msrb.mxu3 %v1229_v37  ;;  %650 = vmatpush.msrb.mxu1 %v1255_v46 }
  0xf7   : > { %706 = vmatpush.msrb.mxu3 %v1237_v40  ;;  %651 = vmatpush.msrb.mxu1 %v1264_v49 }
  0xf9   : > { %707 = vmatpush.msrb.mxu3 %v1246_v43  ;;  %652 = vmatpush.msrb.mxu1 %v1273_v52 }
  0xfb   : > { %708 = vmatpush.msrb.mxu3 %v1255_v46  ;;  %653 = vmatpush.msrb.mxu1 %v1282_v55 }
  0xfd   : > { %709 = vmatpush.msrb.mxu3 %v1264_v49  ;;  %654 = vmatpush.msrb.mxu1 %v1291_v58 }
  0xff   : > { %710 = vmatpush.msrb.mxu3 %v1273_v52  ;;  %655 = vmatpush.msrb.mxu1 %v1300_v61 }
 0x101   : > { %711 = vmatpush.msrb.mxu3 %v1282_v55  ;;  %656 = vmatpush.msrb.mxu1 %v1309_v0 }
 0x103   : > { %712 = vmatpush.msrb.mxu3 %v1291_v58  ;;  %657 = vmatpush.msrb.mxu1 %v1318_v3 }
 0x105   : > { %713 = vmatpush.msrb.mxu3 %v1300_v61  ;;  %658 = vmatpush.msrb.mxu1 %v1327_v6 }
 0x107   : > { %714 = vmatpush.msrb.mxu3 %v1309_v0  ;;  %659 = vmatpush.msrb.mxu1 %v1336_v9 }
 0x109   : > { %715 = vmatpush.msrb.mxu3 %v1318_v3  ;;  %660 = vmatpush.msrb.mxu1 %v1345_v12 }
 0x10b   : > { %716 = vmatpush.msrb.mxu3 %v1327_v6  ;;  %661 = vmatpush.msrb.mxu1 %v1354_v15 }
 0x10d   : > { %717 = vmatpush.msrb.mxu3 %v1336_v9  ;;  %v528_v21 = vpop.f32.mrf.mxu0  ;;  %662 = vmatpush.msrb.mxu1 %v1362_v17 }
 0x10e   : > { %547 = vmatmul.f32.vlgmr.msra.gmra.mxu1 %v528_v21 }
 0x10f   : > { %718 = vmatpush.msrb.mxu3 %v1345_v12 }
 0x111   : > { %719 = vmatpush.msrb.mxu3 %v1354_v15 }
 0x113   : > { %v586_v22 = vpop.f32.mrf.mxu2  ;;  %720 = vmatpush.msrb.mxu3 %v1362_v17 }
 0x114   : > { %605 = vmatmul.f32.vlgmr.msra.gmra.mxu3 %v586_v22 }
 0x12d   : > { %v644_v23 = vpop.f32.mrf.mxu0 }
 0x12e   : > { %663 = vmatmul.f32.vlgmr.msrb.gmra.mxu1 %v644_v23 }
 0x133   : > { %v702_v24 = vpop.f32.mrf.mxu2 }
 0x134   : > { %721 = vmatmul.f32.vlgmr.msrb.gmra.mxu3 %v702_v24 }
 0x14b   : > { %v316_v25 = vpop.f32.mrf.mxu1 }
 0x14c   : > { %320 = vst.msk [vmem:[%s244_s26] sm:$0xff] %vm319_vm0, %v316_v25 }
 0x157   : > { %v374_v26 = vpop.f32.mrf.mxu3 }
 0x158   : > { %840 = vst.msk [vmem:[%s244_s26 + $0x8] sm:$0xff] %vm319_vm0, %v374_v26 }
 0x16b   : > { %v432_v27 = vpop.f32.mrf.mxu1 }
 0x16c   : > { %841 = vst.msk [vmem:[%s244_s26 + $0x10] sm:$0xff] %vm319_vm0, %v432_v27 }
 0x177   : > { %v490_v28 = vpop.f32.mrf.mxu3 }
 0x178   : > { %842 = vst.msk [vmem:[%s244_s26 + $0x18] sm:$0xff] %vm319_vm0, %v490_v28 }
 0x18b   : > { %v548_v29 = vpop.f32.mrf.mxu1 }
 0x18c   : > { %843 = vst.msk [vmem:[%s244_s26 + $0x20] sm:$0xff] %vm319_vm0, %v548_v29 }
 0x197   : > { %v606_v30 = vpop.f32.mrf.mxu3 }
 0x198   : > { %844 = vst.msk [vmem:[%s244_s26 + $0x28] sm:$0xff] %vm319_vm0, %v606_v30 }
 0x1ab   : > { %v664_v31 = vpop.f32.mrf.mxu1 }
 0x1ac   : > { %845 = vst.msk [vmem:[%s244_s26 + $0x30] sm:$0xff] %vm319_vm0, %v664_v31 }
 0x1b7   : > { %v722_v32 = vpop.f32.mrf.mxu3 }
 0x1b8   : > { %846 = vst.msk [vmem:[%s244_s26 + $0x38] sm:$0xff] %vm319_vm0, %v722_v32 }
 0x1b9 PF: > { %s16_s19 = sadd.s32 1, %s993_s19   ;;  %s1513_s27 = sld [smem:[#allocation8_spill]] }
 0x1ba   : > { %p13_p1 = scmp.ge.s32.totalorder %s16_s19, 6   ;;  %s1514_s12 = smov %s969_s13 }
 0x1bb   : > { %s1515_s13 = smov %s973_s14  ;;  %s1516_s14 = smov %s1084_s29 }
 0x1bc   : > { %s1517_s15 = smov %s985_s17  ;;  %s1518_s16 = smov %s989_s18 }
 0x1bd   : > { %s1519_s17 = smov %s1522_s20  ;;  %15 = sbr.rel (!%p13_p1) target bundleno = 5 (0x5), region = 84 }
 0x1bf   : > { %s1520_s18 = smov %s1513_s27 }
 0x1c2   :  { %757 = vsyncpa [#allocation3], 1 }
 0x1c3   :  { %759 = vsyncpa [#allocation3 + $0x1], 1 }

</bundles_post_ra>
